<compile_context>
chip_gen: v6e
topology: v6e:2x2x1
jax: 0.10.0
libtpu: 0.0.40
codegen_flags: <defaults>
</compile_context>

<pallas_src>
import jax
import jax.numpy as jnp
from jax.experimental import pallas as pl
from jax.experimental.pallas import tpu as pltpu

EMBED_SIZE = 384
HIDDEN_SIZE = 4 * EMBED_SIZE
DROPOUT = 0.2


def _round_up(n, m):
    return ((n + m - 1) // m) * m


def _ffn_body(x_ref, w1_ref, b1_ref, w2_ref, b2_ref):
    # x_ref: (tm, E) f32   w1_ref: (E, H) bf16   b1_ref: (1, H) f32
    # w2_ref: (H, E) bf16  b2_ref: (1, E) f32
    x = x_ref[...].astype(jnp.bfloat16)            # cast tile in-kernel (bf16 MXU)

    # Linear 1 + ReLU: bf16 MXU operands, f32 accumulation / epilogue.
    h = jnp.dot(x, w1_ref[...], preferred_element_type=jnp.float32)
    h = jnp.maximum(h + b1_ref[...], 0.0)

    # Linear 2.
    y = jnp.dot(h.astype(jnp.bfloat16), w2_ref[...],
                preferred_element_type=jnp.float32)
    return y + b2_ref[...]


def _ffn_kernel_eval(x_ref, w1_ref, b1_ref, w2_ref, b2_ref, o_ref):
    o_ref[...] = _ffn_body(x_ref, w1_ref, b1_ref, w2_ref, b2_ref).astype(o_ref.dtype)


def _ffn_kernel_train(x_ref, w1_ref, b1_ref, w2_ref, b2_ref, mask_ref, o_ref):
    y = _ffn_body(x_ref, w1_ref, b1_ref, w2_ref, b2_ref)
    o_ref[...] = (y * mask_ref[...]).astype(o_ref.dtype)   # mask holds 0 or 1/(1-p)


def _vmem_estimate_bytes(tm, E, H, with_mask):
    b = 0
    b += 2 * tm * E * 4                  # x tiles (f32, double-buffered)
    b += 2 * tm * E * 4                  # out tiles (f32, double-buffered)
    if with_mask:
        b += 2 * tm * E * 4              # dropout-mask tiles (f32, double-buffered)
    b += (E * H + H * E) * 2             # bf16 weights, single-buffered
    b += (H + E) * 4                     # f32 biases
    b += tm * H * 4                      # live (tm, H) f32 hidden activation
    return b


def feed_forward(x, w1, b1, w2, b2, *, key=None, training=True, tm=256):
    """x: (B, T, E) float32.  w1: (E, H), b1: (1, H), w2: (H, E), b2: (1, E).

    Returns (B, T, E) float32.  Training mode applies inverted dropout using a
    mask derived from `key` (defaults to PRNGKey(0) for determinism).
    """
    B, T, E = x.shape
    H = w1.shape[1]
    M = B * T

    # Bounded row tile: multiple of 8, no larger than the (rounded) problem,
    # capped at 512 to bound the (tm, H) f32 intermediate (<= 3 MiB).
    tm = max(8, min(int(tm), 512))
    tm = min(tm, _round_up(M, 8))
    tm = _round_up(tm, 8)
    grid_m = pl.cdiv(M, tm)
    Mp = grid_m * tm

    x2d = x.reshape(M, E)
    if Mp != M:
        x2d = jnp.pad(x2d, ((0, Mp - M), (0, 0)))

    w1b = w1.astype(jnp.bfloat16)
    w2b = w2.astype(jnp.bfloat16)
    b1f = b1.reshape(1, H).astype(jnp.float32)
    b2f = b2.reshape(1, E).astype(jnp.float32)

    use_mask = training and DROPOUT > 0.0

    x_spec = pl.BlockSpec((tm, E), lambda i: (i, 0))
    # Static weights/biases: constant index_map + single-buffered pipelining.
    w1_spec = pl.BlockSpec((E, H), lambda i: (0, 0), pipeline_mode=pl.Buffered(1))
    b1_spec = pl.BlockSpec((1, H), lambda i: (0, 0), pipeline_mode=pl.Buffered(1))
    w2_spec = pl.BlockSpec((H, E), lambda i: (0, 0), pipeline_mode=pl.Buffered(1))
    b2_spec = pl.BlockSpec((1, E), lambda i: (0, 0), pipeline_mode=pl.Buffered(1))
    out_spec = pl.BlockSpec((tm, E), lambda i: (i, 0))

    in_specs = [x_spec, w1_spec, b1_spec, w2_spec, b2_spec]
    args = [x2d, w1b, b1f, w2b, b2f]

    if use_mask:
        if key is None:
            key = jax.random.PRNGKey(0)
        # Tile-independent mask: generated at logical size M, then padded.
        keep = jax.random.bernoulli(key, 1.0 - DROPOUT, (M, E))
        mask = keep.astype(jnp.float32) * (1.0 / (1.0 - DROPOUT))
        if Mp != M:
            mask = jnp.pad(mask, ((0, Mp - M), (0, 0)))
        in_specs.append(pl.BlockSpec((tm, E), lambda i: (i, 0)))
        args.append(mask)
        kernel = _ffn_kernel_train
    else:
        kernel = _ffn_kernel_eval

    # Generation-aware-ish VMEM cap: real footprint + 2x headroom, never more
    # than 48 MiB (leaves room on v7x's 64 MiB physical VMEM).
    vmem_limit = min(max(2 * _vmem_estimate_bytes(tm, E, H, use_mask), 16 << 20),
                     48 << 20)

    out2d = pl.pallas_call(
        kernel,
        out_shape=jax.ShapeDtypeStruct((Mp, E), x.dtype),
        grid=(grid_m,),
        in_specs=in_specs,
        out_specs=out_spec,
        compiler_params=pltpu.CompilerParams(
            dimension_semantics=("parallel",),   # row tiles shard across TCs (v7x)
            vmem_limit_bytes=vmem_limit,
        ),
    )(*args)

    return out2d[:M].reshape(B, T, E)


def init_params(key, embed_size=EMBED_SIZE):
    """Deterministic init mirroring nn.Linear defaults: U(-1/sqrt(fan_in), +)."""
    hidden = 4 * embed_size
    k1, k2, k3, k4 = jax.random.split(key, 4)
    bound1 = 1.0 / (embed_size ** 0.5)
    bound2 = 1.0 / (hidden ** 0.5)
    # stored as (in, out) so the kernel computes x @ W
    w1 = jax.random.uniform(k1, (embed_size, hidden), jnp.float32, -bound1, bound1)
    b1 = jax.random.uniform(k2, (1, hidden), jnp.float32, -bound1, bound1)
    w2 = jax.random.uniform(k3, (hidden, embed_size), jnp.float32, -bound2, bound2)
    b2 = jax.random.uniform(k4, (1, embed_size), jnp.float32, -bound2, bound2)
    return w1, b1, w2, b2


if __name__ == "__main__":
    key = jax.random.PRNGKey(0)
    kx, kp, kd = jax.random.split(key, 3)

    B, T, E = 2, 8, EMBED_SIZE
    x = jax.random.normal(kx, (B, T, E), dtype=jnp.float32)
    w1, b1, w2, b2 = init_params(kp, E)

    # Training-mode forward (dropout active, deterministic mask from kd).
    y = feed_forward(x, w1, b1, w2, b2, key=kd, training=True)
    y = jax.block_until_ready(y)
    assert y.shape == (B, T, E) and y.dtype == jnp.float32
    assert bool(jnp.all(jnp.isfinite(y)))
    # ~20% of outputs should be exactly zero (dropped positions).
    zero_frac = float(jnp.mean(y == 0.0))
    assert 0.10 < zero_frac < 0.30, zero_frac

    # Eval-mode forward (dropout = identity) — cross-check against a pure-JAX
    # reference computed with the same bf16 MXU operand precision.
    y_eval = jax.block_until_ready(feed_forward(x, w1, b1, w2, b2, training=False))
    xb = x.reshape(-1, E).astype(jnp.bfloat16)
    h_ref = jnp.maximum(
        jnp.dot(xb, w1.astype(jnp.bfloat16), preferred_element_type=jnp.float32) + b1,
        0.0)
    ref = jnp.dot(h_ref.astype(jnp.bfloat16), w2.astype(jnp.bfloat16),
                  preferred_element_type=jnp.float32) + b2
    assert jnp.allclose(y_eval.reshape(-1, E), ref, atol=2e-2, rtol=2e-2)

    print("KERNEL_OK")
</pallas_src>

<mosaic_0001>
module attributes {stable_mosaic.version = 11 : i64} {
  func.func @_ffn_kernel_train(%arg0: i32, %arg1: memref<16x384xf32, #tpu.memory_space<vmem>>, %arg2: memref<384x1536xbf16, #tpu.memory_space<vmem>>, %arg3: memref<1x1536xf32, #tpu.memory_space<vmem>>, %arg4: memref<1536x384xbf16, #tpu.memory_space<vmem>>, %arg5: memref<1x384xf32, #tpu.memory_space<vmem>>, %arg6: memref<16x384xf32, #tpu.memory_space<vmem>>, %arg7: memref<16x384xf32, #tpu.memory_space<vmem>>) attributes {dimension_semantics = [#tpu.dimension_semantics<parallel>], iteration_bounds = array<i64: 1>, scalar_prefetch = 0 : i64, scratch_operands = 0 : i64, tpu.core_type = #tpu.core_type<tc>, window_params = [{transform_indices = @transform_0, window_bounds = array<i64: 16, 384>}, {pipeline_mode = #tpu.pipeline_mode<synchronous>, transform_indices = @transform_1, window_bounds = array<i64: 384, 1536>}, {pipeline_mode = #tpu.pipeline_mode<synchronous>, transform_indices = @transform_2, window_bounds = array<i64: 1, 1536>}, {pipeline_mode = #tpu.pipeline_mode<synchronous>, transform_indices = @transform_3, window_bounds = array<i64: 1536, 384>}, {pipeline_mode = #tpu.pipeline_mode<synchronous>, transform_indices = @transform_4, window_bounds = array<i64: 1, 384>}, {transform_indices = @transform_5, window_bounds = array<i64: 16, 384>}, {transform_indices = @transform_6, window_bounds = array<i64: 16, 384>}]} {
    %c0 = arith.constant 0 : index
    %c0_0 = arith.constant 0 : index
    %0 = vector.load %arg1[%c0, %c0_0] : memref<16x384xf32, #tpu.memory_space<vmem>>, vector<16x384xf32>
    %1 = arith.truncf %0 : vector<16x384xf32> to vector<16x384xbf16>
    %c0_1 = arith.constant 0 : index
    %c0_2 = arith.constant 0 : index
    %2 = vector.load %arg2[%c0_1, %c0_2] : memref<384x1536xbf16, #tpu.memory_space<vmem>>, vector<384x1536xbf16>
    %cst = arith.constant dense<0.000000e+00> : vector<16x1536xf32>
    %3 = tpu.matmul %1, %2, %cst {dimension_numbers = #tpu.dot_dimension_numbers<[1], [0], [0], [1], [0, 0, 1, 1], [], []>} : vector<16x384xbf16>, vector<384x1536xbf16>, vector<16x1536xf32> -> vector<16x1536xf32>
    %c0_3 = arith.constant 0 : index
    %c0_4 = arith.constant 0 : index
    %4 = vector.load %arg3[%c0_3, %c0_4] : memref<1x1536xf32, #tpu.memory_space<vmem>>, vector<1x1536xf32>
    %5 = vector.broadcast %4 : vector<1x1536xf32> to vector<16x1536xf32>
    %6 = arith.addf %3, %5 : vector<16x1536xf32>
    %cst_5 = arith.constant 0.000000e+00 : f32
    %7 = vector.broadcast %cst_5 : f32 to vector<16x1536xf32>
    %8 = arith.maximumf %6, %7 : vector<16x1536xf32>
    %9 = arith.truncf %8 : vector<16x1536xf32> to vector<16x1536xbf16>
    %c0_6 = arith.constant 0 : index
    %c0_7 = arith.constant 0 : index
    %10 = vector.load %arg4[%c0_6, %c0_7] : memref<1536x384xbf16, #tpu.memory_space<vmem>>, vector<1536x384xbf16>
    %cst_8 = arith.constant dense<0.000000e+00> : vector<16x384xf32>
    %11 = tpu.matmul %9, %10, %cst_8 {dimension_numbers = #tpu.dot_dimension_numbers<[1], [0], [0], [1], [0, 0, 1, 1], [], []>} : vector<16x1536xbf16>, vector<1536x384xbf16>, vector<16x384xf32> -> vector<16x384xf32>
    %c0_9 = arith.constant 0 : index
    %c0_10 = arith.constant 0 : index
    %12 = vector.load %arg5[%c0_9, %c0_10] : memref<1x384xf32, #tpu.memory_space<vmem>>, vector<1x384xf32>
    %13 = vector.broadcast %12 : vector<1x384xf32> to vector<16x384xf32>
    %14 = arith.addf %11, %13 : vector<16x384xf32>
    %c0_11 = arith.constant 0 : index
    %c0_12 = arith.constant 0 : index
    %15 = vector.load %arg6[%c0_11, %c0_12] : memref<16x384xf32, #tpu.memory_space<vmem>>, vector<16x384xf32>
    %16 = arith.mulf %14, %15 : vector<16x384xf32>
    %c0_13 = arith.constant 0 : index
    %c0_14 = arith.constant 0 : index
    %17 = vector.load %arg7[%c0_13, %c0_14] : memref<16x384xf32, #tpu.memory_space<vmem>>, vector<16x384xf32>
    tpu.vector_store %arg7[%c0_13, %c0_14], %16 {strides = array<i32>} : memref<16x384xf32, #tpu.memory_space<vmem>>, vector<16x384xf32>,
    return
  }
  func.func @transform_0(%arg0: i32) -> (i32, i32) {
    %c0_i32 = arith.constant 0 : i32
    %c0_i32_0 = arith.constant 0 : i32
    return %arg0, %c0_i32 : i32, i32
  }
  func.func @transform_1(%arg0: i32) -> (i32, i32) {
    %c0_i32 = arith.constant 0 : i32
    %c0_i32_0 = arith.constant 0 : i32
    %c0_i32_1 = arith.constant 0 : i32
    return %c0_i32, %c0_i32_0 : i32, i32
  }
  func.func @transform_2(%arg0: i32) -> (i32, i32) {
    %c0_i32 = arith.constant 0 : i32
    %c0_i32_0 = arith.constant 0 : i32
    %c0_i32_1 = arith.constant 0 : i32
    return %c0_i32, %c0_i32_0 : i32, i32
  }
  func.func @transform_3(%arg0: i32) -> (i32, i32) {
    %c0_i32 = arith.constant 0 : i32
    %c0_i32_0 = arith.constant 0 : i32
    %c0_i32_1 = arith.constant 0 : i32
    return %c0_i32, %c0_i32_0 : i32, i32
  }
  func.func @transform_4(%arg0: i32) -> (i32, i32) {
    %c0_i32 = arith.constant 0 : i32
    %c0_i32_0 = arith.constant 0 : i32
    %c0_i32_1 = arith.constant 0 : i32
    return %c0_i32, %c0_i32_0 : i32, i32
  }
  func.func @transform_5(%arg0: i32) -> (i32, i32) {
    %c0_i32 = arith.constant 0 : i32
    %c0_i32_0 = arith.constant 0 : i32
    return %arg0, %c0_i32 : i32, i32
  }
  func.func @transform_6(%arg0: i32) -> (i32, i32) {
    %c0_i32 = arith.constant 0 : i32
    %c0_i32_0 = arith.constant 0 : i32
    return %arg0, %c0_i32 : i32, i32
  }
}

</mosaic_0001>

<bundles_post_ra>
// kernel: tpu_custom_call.1
= control target key start
LH: loop header
LB: loop body
LE: loop exit
PB: predicated region body
PF: predicated region fallthrough
CT: control target
= control target key end

     0   :  { %11 = vsyncpa [#allocation3], 0  ;;  %s6861_s0 = inlined_call_operand.hbm [shape: f32[16,384], index: 0, kind: input, shape index: {}]   ;;  %s6862_s1 = inlined_call_operand.hbm [shape: bf16[384,1536], index: 1, kind: input, shape index: {}]   ;;  %s6863_s2 = inlined_call_operand.hbm [shape: f32[1,1536], index: 2, kind: input, shape index: {}]   ;;  %s6864_s3 = inlined_call_operand.hbm [shape: bf16[1536,384], index: 3, kind: input, shape index: {}]   ;;  %s6865_s4 = inlined_call_operand.hbm [shape: f32[1,384], index: 4, kind: input, shape index: {}]   ;;  %s6866_s5 = inlined_call_operand.hbm [shape: f32[16,384], index: 5, kind: input, shape index: {}]   ;;  %s6867_s6 = inlined_call_operand.hbm [shape: f32[16,384], index: 6, kind: output, shape index: {}]  }
   0x1   :  { %12 = vsyncpa [#allocation6], 0 }
   0x2   :  { %13 = vsyncpa [#allocation9], 0 }
   0x3   :  { %14 = vsyncpa [#allocation12], 0 }
   0x4   :  { %15 = vsyncpa [#allocation4], 0  ;;  %s6624_s21 = smov [#allocation5]  }
   0x5   :  { %s33_s22 = sshll.u32 %s6624_s21, 4  ;;  %s34_s22 = int_to_ptr.vmem [resolvable:$true] %s33_s22 }
   0x6   :  { %s6482_s23 = scalar_lea.vmem %s34_s22, 36864  ;;  %p6487_p1 = scmp.lt.s32.totalorder %s34_s22, %s34_s22 }
   0x7   :  { %p6483_p0 = scmp.ne.s32.totalorder %s34_s22, %s6482_s23  ;;  %p6488_p2 = scmp.lt.s32.totalorder %s6482_s23, %s6482_s23 }
   0x9   :  { %p6489_p3 = por %p6488_p2, %p6487_p1 }
   0xb   :  { %p6490_p4 = pnand %p6489_p3, %p6483_p0 }
   0xd   :  { %6493 = shalt.err (!%p6490_p4)
}
   0xe   :  { %s6625_s24 = smov 768   ;;  %s6626_s25 = smov 48  }
   0xf   :  { %39 = dma.hbm_to_vmem [thread:$0]  %s6862_s1, 36864, %s34_s22, [#allocation6], %s6625_s24, %s6625_s24, %s6626_s25  }
  0x10   :  { %s6627_s28 = smov [#allocation8]  }
  0x11   :  { %s55_s29 = sshll.u32 %s6627_s28, 4  ;;  %s56_s29 = int_to_ptr.vmem [resolvable:$true] %s55_s29 }
  0x12   :  { %s6502_s30 = scalar_lea.vmem %s56_s29, 36864  ;;  %p6507_p6 = scmp.lt.s32.totalorder %s56_s29, %s56_s29 }
  0x13   :  { %p6503_p5 = scmp.ne.s32.totalorder %s56_s29, %s6502_s30  ;;  %p6508_p7 = scmp.lt.s32.totalorder %s6502_s30, %s6502_s30 }
  0x15   :  { %p6509_p8 = por %p6508_p7, %p6507_p6 }
  0x17   :  { %p6510_p9 = pnand %p6509_p8, %p6503_p5 }
  0x19   :  { %6513 = shalt.err (!%p6510_p9)
}
  0x1a   :  { %s6628_s7 = smov 192   ;;  %s6629_s8 = smov 12  }
  0x1b   :  { %61 = dma.hbm_to_vmem [thread:$0]  %s6864_s3, 36864, %s56_s29, [#allocation9], %s6628_s7, %s6628_s7, %s6629_s8  }
  0x1c   :  { %s6630_s11 = smov [#allocation2]  }
  0x1d   :  { %s21_s12 = sshll.u32 %s6630_s11, 4  ;;  %s22_s12 = int_to_ptr.vmem [resolvable:$true] %s21_s12 }
  0x1e   :  { %s6522_s1 = scalar_lea.vmem %s22_s12, 768  ;;  %p6527_p11 = scmp.lt.s32.totalorder %s22_s12, %s22_s12 }
  0x1f   :  { %p6523_p10 = scmp.ne.s32.totalorder %s22_s12, %s6522_s1  ;;  %p6528_p12 = scmp.lt.s32.totalorder %s6522_s1, %s6522_s1 }
  0x21   :  { %p6529_p13 = por %p6528_p12, %p6527_p11 }
  0x23   :  { %p6530_p0 = pnand %p6529_p13, %p6523_p10 }
  0x25   :  { %6533 = shalt.err (!%p6530_p0)
}
  0x26   :  { %s6631_s13 = smov 384   ;;  %s6632_s14 = smov 24  }
  0x27   :  { %27 = dma.hbm_to_vmem [thread:$0]  %s6861_s0, 768, %s22_s12, [#allocation3], %s6631_s13, %s6631_s13, %s6632_s14  }
  0x28   :  { %s6633_s3 = smov [#allocation7]   ;;  %s6634_s18 = smov [#allocation10]  }
  0x29   :  { %s46_s17 = sshll.u32 %s6633_s3, 4  ;;  %s68_s19 = sshll.u32 %s6634_s18, 4  ;;  %s47_s17 = int_to_ptr.vmem [resolvable:$true] %s46_s17  ;;  %s69_s19 = int_to_ptr.vmem [resolvable:$true] %s68_s19 }
  0x2a   :  { %s6542_s20 = scalar_lea.vmem %s47_s17, 192  ;;  %p6547_p2 = scmp.lt.s32.totalorder %s47_s17, %s47_s17 }
  0x2b   :  { %p6543_p1 = scmp.ne.s32.totalorder %s47_s17, %s6542_s20  ;;  %p6548_p3 = scmp.lt.s32.totalorder %s6542_s20, %s6542_s20 }
  0x2d   :  { %p6549_p4 = por %p6548_p3, %p6547_p2 }
  0x2f   :  { %p6550_p5 = pnand %p6549_p4, %p6543_p1 }
  0x31   :  { %6553 = shalt.err (!%p6550_p5)
}
  0x32   :  { %49 = dma.hbm_to_vmem [thread:$0]  %s6863_s2, 192, %s47_s17, [#allocation6]  }
  0x33   :  { %s6562_s23 = scalar_lea.vmem %s69_s19, 48  ;;  %s6566_s0 = scalar_lea.vmem %s69_s19, 64 }
  0x34   :  { %p6563_p6 = scmp.ne.s32.totalorder %s69_s19, %s6562_s23  ;;  %p6567_p7 = scmp.lt.s32.totalorder %s69_s19, %s69_s19 }
  0x35   :  { %p6568_p8 = scmp.lt.s32.totalorder %s6566_s0, %s6562_s23 }
  0x37   :  { %p6569_p9 = por %p6568_p8, %p6567_p7 }
  0x39   :  { %p6570_p10 = pnand %p6569_p9, %p6563_p6 }
  0x3b   :  { %6573 = shalt.err (!%p6570_p10)
}
  0x3c   :  { %71 = dma.hbm_to_vmem [thread:$0]  %s6865_s4, 48, %s69_s19, [#allocation9]  }
  0x3d   :  { %s6635_s26 = smov [#allocation11]  }
  0x3e   :  { %s77_s27 = sshll.u32 %s6635_s26, 4  ;;  %s78_s27 = int_to_ptr.vmem [resolvable:$true] %s77_s27 }
  0x3f   :  { %s6582_s28 = scalar_lea.vmem %s78_s27, 768  ;;  %p6587_p12 = scmp.lt.s32.totalorder %s78_s27, %s78_s27 }
  0x40   :  { %p6583_p11 = scmp.ne.s32.totalorder %s78_s27, %s6582_s28  ;;  %p6588_p13 = scmp.lt.s32.totalorder %s6582_s28, %s6582_s28 }
  0x42   :  { %p6589_p0 = por %p6588_p13, %p6587_p12 }
  0x44   :  { %p6590_p1 = pnand %p6589_p0, %p6583_p11 }
  0x46   :  { %6593 = shalt.err (!%p6590_p1)
}
  0x47   :  { %83 = dma.hbm_to_vmem [thread:$0]  %s6866_s5, 768, %s78_s27, [#allocation12], %s6631_s13, %s6631_s13, %s6632_s14  }
  0x48   :  { %6614 = dma.done.wait [#allocation3], 768  }
  0x49   :  { %6615 = vsyncadd [#allocation3], 4294966528 }
  0x4a   :  { %6616 = dma.done.wait [#allocation6], 37056  }
  0x4b   :  { %6617 = vsyncadd [#allocation6], 4294930240 }
  0x4c   :  { %6618 = dma.done.wait [#allocation9], 36912  }
  0x4d   :  { %6619 = vsyncadd [#allocation9], 4294930384 }
  0x4e   :  { %6620 = dma.done.wait [#allocation12], 768  }
  0x4f   :  { %6621 = vsyncadd [#allocation12], 4294966528  ;;  %v6636_v0 = vmov 0   ;;  %v5657_v1 = vld [vmem:[#allocation5 + $0x2a4] ss:$48 sps:$4 sm:$0xff]   ;;  %v108_v34 = vld [vmem:[#allocation2 + $0x28] sm:$0xff] }
  0x50   :  { %1979 = vmatprep.mubr.bf16.mxu1 %v6636_v0  ;;  %v5659_v2 = vld [vmem:[#allocation5 + $0x8a4] ss:$48 sps:$4 sm:$0xff]   ;;  %1904 = vmatprep.subr.bf16.mxu0 %v5657_v1  ;;  %v5661_v3 = vld [vmem:[#allocation5 + $0x2a0] ss:$48 sps:$4 sm:$0xff]   ;;  %v5709_v36 = vld [vmem:[#allocation5 + $0x2ac] ss:$48 sps:$4 sm:$0xff]  }
  0x51   :  { %v5662_v4 = vld [vmem:[#allocation5 + $0x8a0] ss:$48 sps:$4 sm:$0xff]   ;;  %1947 = vmatprep.subr.bf16.mxu1 %v5659_v2  ;;  %v5663_v5 = vld [vmem:[#allocation5 + $0x244] ss:$48 sps:$4 sm:$0xff]   ;;  %1905 = vmatpush1.bf16.msra.mxu0 %v5661_v3  ;;  %v5707_v38 = vld [vmem:[#allocation5 + $0x2a8] ss:$48 sps:$4 sm:$0xff]  }
  0x52   :  { %1948 = vmatpush1.bf16.msra.mxu1 %v5662_v4  ;;  %v5665_v6 = vld [vmem:[#allocation5 + $0x844] ss:$48 sps:$4 sm:$0xff]   ;;  %v5667_v7 = vld [vmem:[#allocation5 + $0x240] ss:$48 sps:$4 sm:$0xff]   ;;  %1906 = vmatprep.subr.bf16.mxu0 %v5663_v5  ;;  %v5715_v41 = vld [vmem:[#allocation5 + $0x24c] ss:$48 sps:$4 sm:$0xff]  }
  0x53   :  { %v5668_v8 = vld [vmem:[#allocation5 + $0x840] ss:$48 sps:$4 sm:$0xff]   ;;  %1949 = vmatprep.subr.bf16.mxu1 %v5665_v6  ;;  %v5669_v9 = vld [vmem:[#allocation5 + $0x1e4] ss:$48 sps:$4 sm:$0xff]   ;;  %v5713_v42 = vld [vmem:[#allocation5 + $0x248] ss:$48 sps:$4 sm:$0xff]  }
  0x54   :  { %v5671_v10 = vld [vmem:[#allocation5 + $0x7e4] ss:$48 sps:$4 sm:$0xff]   ;;  %v5673_v11 = vld [vmem:[#allocation5 + $0x1e0] ss:$48 sps:$4 sm:$0xff]   ;;  %v5721_v45 = vld [vmem:[#allocation5 + $0x1ec] ss:$48 sps:$4 sm:$0xff]  }
  0x55   :  { %v5674_v12 = vld [vmem:[#allocation5 + $0x7e0] ss:$48 sps:$4 sm:$0xff]   ;;  %1907 = vmatpush1.bf16.msra.mxu0 %v5667_v7  ;;  %v5675_v13 = vld [vmem:[#allocation5 + $0x184] ss:$48 sps:$4 sm:$0xff]   ;;  %v5719_v46 = vld [vmem:[#allocation5 + $0x1e8] ss:$48 sps:$4 sm:$0xff]  }
  0x56   :  { %1950 = vmatpush1.bf16.msra.mxu1 %v5668_v8  ;;  %1908 = vmatprep.subr.bf16.mxu0 %v5669_v9  ;;  %v5677_v14 = vld [vmem:[#allocation5 + $0x784] ss:$48 sps:$4 sm:$0xff]   ;;  %v5679_v15 = vld [vmem:[#allocation5 + $0x180] ss:$48 sps:$4 sm:$0xff]   ;;  %v5727_v49 = vld [vmem:[#allocation5 + $0x18c] ss:$48 sps:$4 sm:$0xff]  }
  0x57   :  { %1951 = vmatprep.subr.bf16.mxu1 %v5671_v10  ;;  %v5680_v16 = vld [vmem:[#allocation5 + $0x780] ss:$48 sps:$4 sm:$0xff]   ;;  %v5681_v17 = vld [vmem:[#allocation5 + $0x124] ss:$48 sps:$4 sm:$0xff]   ;;  %v104_v50 = vld [vmem:[#allocation2 + $0x8] sm:$0xff]  ;;  %s6637_s4 = smov [#allocation13]  }
  0x58   :  { %v5683_v18 = vld [vmem:[#allocation5 + $0x724] ss:$48 sps:$4 sm:$0xff]   ;;  %v5685_v19 = vld [vmem:[#allocation5 + $0x120] ss:$48 sps:$4 sm:$0xff]   ;;  %v5725_v52 = vld [vmem:[#allocation5 + $0x188] ss:$48 sps:$4 sm:$0xff]  }
  0x59   :  { %1909 = vmatpush1.bf16.msra.mxu0 %v5673_v11  ;;  %v5686_v20 = vld [vmem:[#allocation5 + $0x720] ss:$48 sps:$4 sm:$0xff]   ;;  %v5687_v21 = vld [vmem:[#allocation5 + $0xc4] ss:$48 sps:$4 sm:$0xff]   ;;  %v5733_v56 = vld [vmem:[#allocation5 + $0x12c] ss:$48 sps:$4 sm:$0xff]  }
  0x5a   :  { %1952 = vmatpush1.bf16.msra.mxu1 %v5674_v12  ;;  %1910 = vmatprep.subr.bf16.mxu0 %v5675_v13  ;;  %v5689_v22 = vld [vmem:[#allocation5 + $0x6c4] ss:$48 sps:$4 sm:$0xff]   ;;  %v5691_v23 = vld [vmem:[#allocation5 + $0xc0] ss:$48 sps:$4 sm:$0xff]   ;;  %v5731_v57 = vld [vmem:[#allocation5 + $0x128] ss:$48 sps:$4 sm:$0xff]  }
  0x5b   :  { %1953 = vmatprep.subr.bf16.mxu1 %v5677_v14  ;;  %v5692_v24 = vld [vmem:[#allocation5 + $0x6c0] ss:$48 sps:$4 sm:$0xff]   ;;  %v5693_v25 = vld [vmem:[#allocation5 + $0x64] ss:$48 sps:$4 sm:$0xff]   ;;  %v5739_v60 = vld [vmem:[#allocation5 + $0xcc] ss:$48 sps:$4 sm:$0xff]  }
  0x5c   :  { %v5695_v26 = vld [vmem:[#allocation5 + $0x664] ss:$48 sps:$4 sm:$0xff]   ;;  %v5697_v27 = vld [vmem:[#allocation5 + $0x60] ss:$48 sps:$4 sm:$0xff]   ;;  %v5737_v61 = vld [vmem:[#allocation5 + $0xc8] ss:$48 sps:$4 sm:$0xff]  }
  0x5d   :  { %1911 = vmatpush1.bf16.msra.mxu0 %v5679_v15  ;;  %v5698_v28 = vld [vmem:[#allocation5 + $0x660] ss:$48 sps:$4 sm:$0xff]   ;;  %v5699_v29 = vld [vmem:[#allocation5 + $0x4] ss:$48 sps:$4 sm:$0xff]   ;;  %v5745_v1 = vld [vmem:[#allocation5 + $0x6c] ss:$48 sps:$4 sm:$0xff]  }
  0x5e   :  { %1954 = vmatpush1.bf16.msra.mxu1 %v5680_v16  ;;  %1912 = vmatprep.subr.bf16.mxu0 %v5681_v17  ;;  %v5701_v30 = vld [vmem:[#allocation5 + $0x604] ss:$48 sps:$4 sm:$0xff]   ;;  %v5703_v31 = vld [vmem:[#allocation5] ss:$48 sps:$4 sm:$0xff]   ;;  %v5743_v2 = vld [vmem:[#allocation5 + $0x68] ss:$48 sps:$4 sm:$0xff]  }
  0x5f   :  { %1955 = vmatprep.subr.bf16.mxu1 %v5683_v18  ;;  %v5704_v32 = vld [vmem:[#allocation5 + $0x600] ss:$48 sps:$4 sm:$0xff]   ;;  %v5705_v35 = vld [vmem:[#allocation5 + $0x5a4] ss:$48 sps:$4 sm:$0xff]   ;;  %v5751_v5 = vld [vmem:[#allocation5 + $0xc] ss:$48 sps:$4 sm:$0xff]  }
  0x60   :  { %v105_v33 = vld [vmem:[#allocation2 + $0x10] sm:$0xff]  ;;  %v107_v51 = vld [vmem:[#allocation2 + $0x20] sm:$0xff]  ;;  %v5749_v6 = vld [vmem:[#allocation5 + $0x8] ss:$48 sps:$4 sm:$0xff]   ;;  %s4920_s5 = sshll.u32 %s6637_s4, 4  ;;  %s4921_s5 = int_to_ptr.vmem [resolvable:$true] %s4920_s5 }
  0x61   :  { %1913 = vmatpush1.bf16.msra.mxu0 %v5685_v19  ;;  %v6698_v37 = vpack.c.bf16 %v108_v34, %v105_v33  ;;  %v5710_v39 = vld [vmem:[#allocation5 + $0x5a0] ss:$48 sps:$4 sm:$0xff]   ;;  %v5711_v40 = vld [vmem:[#allocation5 + $0x544] ss:$48 sps:$4 sm:$0xff]   ;;  %v6701_v54 = vpack.c.bf16 %v107_v51, %v104_v50  ;;  %v106_v9 = vld [vmem:[#allocation2 + $0x18] sm:$0xff]  ;;  %s6594_s30 = scalar_lea.vmem %s4921_s5, 768  ;;  %p6599_p3 = scmp.lt.s32.totalorder %s4921_s5, %s4921_s5 }
  0x62   :  { %1956 = vmatpush1.bf16.msra.mxu1 %v5686_v20  ;;  %1914 = vmatprep.subr.bf16.mxu0 %v5687_v21  ;;  %v5716_v43 = vld [vmem:[#allocation5 + $0x540] ss:$48 sps:$4 sm:$0xff]   ;;  %v5717_v44 = vld [vmem:[#allocation5 + $0x4e4] ss:$48 sps:$4 sm:$0xff]   ;;  %v5755_v10 = vld [vmem:[#allocation5 + $0x5ac] ss:$48 sps:$4 sm:$0xff]   ;;  %p6595_p2 = scmp.ne.s32.totalorder %s4921_s5, %s6594_s30  ;;  %p6600_p4 = scmp.lt.s32.totalorder %s6594_s30, %s6594_s30 }
  0x63   :  { %1957 = vmatprep.subr.bf16.mxu1 %v5689_v22  ;;  %v5722_v47 = vld [vmem:[#allocation5 + $0x4e0] ss:$48 sps:$4 sm:$0xff]   ;;  %v5723_v48 = vld [vmem:[#allocation5 + $0x484] ss:$48 sps:$4 sm:$0xff]   ;;  %1936 = vmatprep.mubr.bf16.mxu0 %v6701_v54  ;;  %v5758_v11 = vld [vmem:[#allocation5 + $0x8ac] ss:$48 sps:$4 sm:$0xff]  }
  0x64   :  { %v5728_v53 = vld [vmem:[#allocation5 + $0x480] ss:$48 sps:$4 sm:$0xff]   ;;  %v5729_v55 = vld [vmem:[#allocation5 + $0x424] ss:$48 sps:$4 sm:$0xff]   ;;  %v5753_v13 = vld [vmem:[#allocation5 + $0x5a8] ss:$48 sps:$4 sm:$0xff]   ;;  %p6601_p5 = por %p6600_p4, %p6599_p3 }
  0x65   :  { %1915 = vmatpush1.bf16.msra.mxu0 %v5691_v23  ;;  %v5734_v58 = vld [vmem:[#allocation5 + $0x420] ss:$48 sps:$4 sm:$0xff]   ;;  %v5735_v59 = vld [vmem:[#allocation5 + $0x3c4] ss:$48 sps:$4 sm:$0xff]   ;;  %v5756_v14 = vld [vmem:[#allocation5 + $0x8a8] ss:$48 sps:$4 sm:$0xff]  }
  0x66   :  { %1958 = vmatpush1.bf16.msra.mxu1 %v5692_v24  ;;  %1916 = vmatprep.subr.bf16.mxu0 %v5693_v25  ;;  %v5740_v62 = vld [vmem:[#allocation5 + $0x3c0] ss:$48 sps:$4 sm:$0xff]   ;;  %v5741_v63 = vld [vmem:[#allocation5 + $0x364] ss:$48 sps:$4 sm:$0xff]   ;;  %v5761_v15 = vld [vmem:[#allocation5 + $0x54c] ss:$48 sps:$4 sm:$0xff]   ;;  %p6602_p6 = pnand %p6601_p5, %p6595_p2 }
  0x67   :  { %1959 = vmatprep.subr.bf16.mxu1 %v5695_v26  ;;  %v5746_v3 = vld [vmem:[#allocation5 + $0x360] ss:$48 sps:$4 sm:$0xff]   ;;  %v5747_v4 = vld [vmem:[#allocation5 + $0x304] ss:$48 sps:$4 sm:$0xff]   ;;  %v5764_v16 = vld [vmem:[#allocation5 + $0x84c] ss:$48 sps:$4 sm:$0xff]  }
  0x68   :  { %v5752_v7 = vld [vmem:[#allocation5 + $0x300] ss:$48 sps:$4 sm:$0xff]   ;;  %v5759_v17 = vld [vmem:[#allocation5 + $0x548] ss:$48 sps:$4 sm:$0xff]   ;;  %v5767_v19 = vld [vmem:[#allocation5 + $0x4ec] ss:$48 sps:$4 sm:$0xff]  }
  0x69   :  { %1917 = vmatpush1.bf16.msra.mxu0 %v5697_v27  ;;  %v103_v8 = vld [vmem:[#allocation2] sm:$0xff]  ;;  %v5762_v18 = vld [vmem:[#allocation5 + $0x848] ss:$48 sps:$4 sm:$0xff]   ;;  %v5770_v20 = vld [vmem:[#allocation5 + $0x7ec] ss:$48 sps:$4 sm:$0xff]  }
  0x6a   :  { %1960 = vmatpush1.bf16.msra.mxu1 %v5698_v28  ;;  %1918 = vmatprep.subr.bf16.mxu0 %v5699_v29  ;;  %v6705_v12 = vpack.c.bf16 %v106_v9, %v103_v8  ;;  %v5765_v21 = vld [vmem:[#allocation5 + $0x4e8] ss:$48 sps:$4 sm:$0xff]   ;;  %v5773_v23 = vld [vmem:[#allocation5 + $0x48c] ss:$48 sps:$4 sm:$0xff]   ;;  %v5807_v50 = vld [vmem:[#allocation5 + $0x250] ss:$48 sps:$4 sm:$0xff]  }
  0x6b   :  { %1961 = vmatprep.subr.bf16.mxu1 %v5701_v30  ;;  %v5768_v22 = vld [vmem:[#allocation5 + $0x7e8] ss:$48 sps:$4 sm:$0xff]   ;;  %v5776_v24 = vld [vmem:[#allocation5 + $0x78c] ss:$48 sps:$4 sm:$0xff]   ;;  %v5810_v51 = vld [vmem:[#allocation5 + $0x850] ss:$48 sps:$4 sm:$0xff]  }
  0x6c   :  { %v5771_v25 = vld [vmem:[#allocation5 + $0x488] ss:$48 sps:$4 sm:$0xff]   ;;  %v5779_v27 = vld [vmem:[#allocation5 + $0x42c] ss:$48 sps:$4 sm:$0xff]   ;;  %v5837_v8 = vld [vmem:[#allocation5 + $0x70] ss:$48 sps:$4 sm:$0xff]  }
  0x6d   :  { %1919 = vmatpush1.bf16.msra.mxu0 %v5703_v31  ;;  %v5774_v26 = vld [vmem:[#allocation5 + $0x788] ss:$48 sps:$4 sm:$0xff]   ;;  %v5782_v28 = vld [vmem:[#allocation5 + $0x72c] ss:$48 sps:$4 sm:$0xff]   ;;  %v5840_v9 = vld [vmem:[#allocation5 + $0x670] ss:$48 sps:$4 sm:$0xff]  }
  0x6e   :  { %1962 = vmatpush1.bf16.msra.mxu1 %v5704_v32  ;;  %1920 = vmatprep.subr.bf16.mxu0 %v5705_v35  ;;  %v5777_v29 = vld [vmem:[#allocation5 + $0x428] ss:$48 sps:$4 sm:$0xff]   ;;  %v5785_v31 = vld [vmem:[#allocation5 + $0x3cc] ss:$48 sps:$4 sm:$0xff]  }
  0x6f   :  { %1990 = vmatprep.subr.bf16.mxu1 %v5709_v36  ;;  %v5780_v30 = vld [vmem:[#allocation5 + $0x728] ss:$48 sps:$4 sm:$0xff]   ;;  %v5788_v32 = vld [vmem:[#allocation5 + $0x6cc] ss:$48 sps:$4 sm:$0xff]  }
  0x70   :  { %v5783_v33 = vld [vmem:[#allocation5 + $0x3c8] ss:$48 sps:$4 sm:$0xff]   ;;  %v5791_v35 = vld [vmem:[#allocation5 + $0x36c] ss:$48 sps:$4 sm:$0xff]  }
  0x71   :  { %1980 = vmatmul.mubr.bf16.vlgmr.msra.gmra.mxu1 %v6698_v37  ;;  %1921 = vmatpush2.bf16.msra.mxu0 %v5710_v39  ;;  %v5786_v34 = vld [vmem:[#allocation5 + $0x6c8] ss:$48 sps:$4 sm:$0xff]   ;;  %v5794_v36 = vld [vmem:[#allocation5 + $0x66c] ss:$48 sps:$4 sm:$0xff]  }
  0x72   :  { %1991 = vmatpush1.bf16.msra.mxu1 %v5707_v38  ;;  %1922 = vmatprep.subr.bf16.mxu0 %v5711_v40  ;;  %v5789_v38 = vld [vmem:[#allocation5 + $0x368] ss:$48 sps:$4 sm:$0xff]   ;;  %v5797_v40 = vld [vmem:[#allocation5 + $0x30c] ss:$48 sps:$4 sm:$0xff]  }
  0x73   :  { %1992 = vmatprep.subr.bf16.mxu1 %v5715_v41  ;;  %2022 = vmatprep.mubr.bf16.mxu1 %v6701_v54  ;;  %v5792_v39 = vld [vmem:[#allocation5 + $0x668] ss:$48 sps:$4 sm:$0xff]   ;;  %v5800_v41 = vld [vmem:[#allocation5 + $0x60c] ss:$48 sps:$4 sm:$0xff]  }
  0x75   :  { %1923 = vmatpush2.bf16.msra.mxu0 %v5716_v43  ;;  %v5798_v43 = vld [vmem:[#allocation5 + $0x608] ss:$48 sps:$4 sm:$0xff]  }
  0x76   :  { %1993 = vmatpush1.bf16.msra.mxu1 %v5713_v42  ;;  %1924 = vmatprep.subr.bf16.mxu0 %v5717_v44  ;;  %v5795_v42 = vld [vmem:[#allocation5 + $0x308] ss:$48 sps:$4 sm:$0xff]   ;;  %v5803_v44 = vld [vmem:[#allocation5 + $0x2b4] ss:$48 sps:$4 sm:$0xff]  }
  0x77   :  { %1994 = vmatprep.subr.bf16.mxu1 %v5721_v45  ;;  %v5806_v45 = vld [vmem:[#allocation5 + $0x8b4] ss:$48 sps:$4 sm:$0xff]  }
  0x79   :  { %1925 = vmatpush2.bf16.msra.mxu0 %v5722_v47  ;;  %v5804_v47 = vld [vmem:[#allocation5 + $0x8b0] ss:$48 sps:$4 sm:$0xff]  }
  0x7a   :  { %1995 = vmatpush1.bf16.msra.mxu1 %v5719_v46  ;;  %1926 = vmatprep.subr.bf16.mxu0 %v5723_v48  ;;  %v5801_v46 = vld [vmem:[#allocation5 + $0x2b0] ss:$48 sps:$4 sm:$0xff]   ;;  %v5809_v48 = vld [vmem:[#allocation5 + $0x254] ss:$48 sps:$4 sm:$0xff]  }
  0x7b   :  { %1996 = vmatprep.subr.bf16.mxu1 %v5727_v49  ;;  %v5812_v49 = vld [vmem:[#allocation5 + $0x854] ss:$48 sps:$4 sm:$0xff]  }
  0x7d   :  { %1927 = vmatpush2.bf16.msra.mxu0 %v5728_v53  ;;  %v5818_v53 = vld [vmem:[#allocation5 + $0x7f4] ss:$48 sps:$4 sm:$0xff]  }
  0x7e   :  { %1997 = vmatpush1.bf16.msra.mxu1 %v5725_v52  ;;  %1928 = vmatprep.subr.bf16.mxu0 %v5729_v55  ;;  %v5815_v52 = vld [vmem:[#allocation5 + $0x1f4] ss:$48 sps:$4 sm:$0xff]   ;;  %v5813_v55 = vld [vmem:[#allocation5 + $0x1f0] ss:$48 sps:$4 sm:$0xff]  }
  0x7f   :  { %1998 = vmatprep.subr.bf16.mxu1 %v5733_v56  ;;  %v5816_v56 = vld [vmem:[#allocation5 + $0x7f0] ss:$48 sps:$4 sm:$0xff]  }
  0x81   :  { %1929 = vmatpush2.bf16.msra.mxu0 %v5734_v58  ;;  %v5824_v58 = vld [vmem:[#allocation5 + $0x794] ss:$48 sps:$4 sm:$0xff]  }
  0x82   :  { %1999 = vmatpush1.bf16.msra.mxu1 %v5731_v57  ;;  %1930 = vmatprep.subr.bf16.mxu0 %v5735_v59  ;;  %v5821_v57 = vld [vmem:[#allocation5 + $0x194] ss:$48 sps:$4 sm:$0xff]   ;;  %v5819_v59 = vld [vmem:[#allocation5 + $0x190] ss:$48 sps:$4 sm:$0xff]  }
  0x83   :  { %2000 = vmatprep.subr.bf16.mxu1 %v5739_v60  ;;  %v5822_v60 = vld [vmem:[#allocation5 + $0x790] ss:$48 sps:$4 sm:$0xff]  }
  0x85   :  { %1931 = vmatpush2.bf16.msra.mxu0 %v5740_v62  ;;  %v5830_v62 = vld [vmem:[#allocation5 + $0x734] ss:$48 sps:$4 sm:$0xff]  }
  0x86   :  { %2001 = vmatpush1.bf16.msra.mxu1 %v5737_v61  ;;  %1932 = vmatprep.subr.bf16.mxu0 %v5741_v63  ;;  %v5827_v61 = vld [vmem:[#allocation5 + $0x134] ss:$48 sps:$4 sm:$0xff]   ;;  %v5825_v63 = vld [vmem:[#allocation5 + $0x130] ss:$48 sps:$4 sm:$0xff]  }
  0x87   :  { %2002 = vmatprep.subr.bf16.mxu1 %v5745_v1  ;;  %v5828_v1 = vld [vmem:[#allocation5 + $0x730] ss:$48 sps:$4 sm:$0xff]  }
  0x89   :  { %1933 = vmatpush2.bf16.msra.mxu0 %v5746_v3  ;;  %v5836_v3 = vld [vmem:[#allocation5 + $0x6d4] ss:$48 sps:$4 sm:$0xff]  }
  0x8a   :  { %2003 = vmatpush1.bf16.msra.mxu1 %v5743_v2  ;;  %1934 = vmatprep.subr.bf16.mxu0 %v5747_v4  ;;  %v5833_v2 = vld [vmem:[#allocation5 + $0xd4] ss:$48 sps:$4 sm:$0xff]   ;;  %v5831_v4 = vld [vmem:[#allocation5 + $0xd0] ss:$48 sps:$4 sm:$0xff]  }
  0x8b   :  { %2004 = vmatprep.subr.bf16.mxu1 %v5751_v5  ;;  %v5834_v5 = vld [vmem:[#allocation5 + $0x6d0] ss:$48 sps:$4 sm:$0xff]  }
  0x8d   :  { %1935 = vmatpush2.bf16.msra.mxu0 %v5752_v7  ;;  %v5842_v7 = vld [vmem:[#allocation5 + $0x674] ss:$48 sps:$4 sm:$0xff]  }
  0x8e   :  { %2005 = vmatpush1.bf16.msra.mxu1 %v5749_v6  ;;  %2033 = vmatprep.subr.bf16.mxu0 %v5758_v11  ;;  %v5839_v6 = vld [vmem:[#allocation5 + $0x74] ss:$48 sps:$4 sm:$0xff]  }
  0x8f   :  { %2006 = vmatprep.subr.bf16.mxu1 %v5755_v10  ;;  %v5845_v10 = vld [vmem:[#allocation5 + $0x14] ss:$48 sps:$4 sm:$0xff]  }
  0x90   :  { %1937 = vmatmul.mubr.bf16.vlgmr.msra.gmra.mxu0 %v6705_v12  ;;  %v5848_v11 = vld [vmem:[#allocation5 + $0x614] ss:$48 sps:$4 sm:$0xff]  }
  0x91   :  { %2034 = vmatpush1.bf16.msra.mxu0 %v5756_v14  ;;  %2065 = vmatprep.mubr.bf16.mxu0 %v6636_v0  ;;  %v5846_v14 = vld [vmem:[#allocation5 + $0x610] ss:$48 sps:$4 sm:$0xff]  }
  0x92   :  { %2007 = vmatpush2.bf16.msra.mxu1 %v5753_v13  ;;  %2035 = vmatprep.subr.bf16.mxu0 %v5764_v16  ;;  %v5843_v13 = vld [vmem:[#allocation5 + $0x10] ss:$48 sps:$4 sm:$0xff]   ;;  %v5854_v16 = vld [vmem:[#allocation5 + $0x2bc] ss:$48 sps:$4 sm:$0xff]  }
  0x93   :  { %2008 = vmatprep.subr.bf16.mxu1 %v5761_v15  ;;  %v5851_v15 = vld [vmem:[#allocation5 + $0x5b4] ss:$48 sps:$4 sm:$0xff]  }
  0x95   :  { %2036 = vmatpush1.bf16.msra.mxu0 %v5762_v18  ;;  %v5852_v18 = vld [vmem:[#allocation5 + $0x2b8] ss:$48 sps:$4 sm:$0xff]  }
  0x96   :  { %2009 = vmatpush2.bf16.msra.mxu1 %v5759_v17  ;;  %2037 = vmatprep.subr.bf16.mxu0 %v5770_v20  ;;  %v5849_v17 = vld [vmem:[#allocation5 + $0x5b0] ss:$48 sps:$4 sm:$0xff]   ;;  %v5860_v20 = vld [vmem:[#allocation5 + $0x25c] ss:$48 sps:$4 sm:$0xff]  }
  0x97   :  { %2010 = vmatprep.subr.bf16.mxu1 %v5767_v19  ;;  %v5857_v19 = vld [vmem:[#allocation5 + $0x554] ss:$48 sps:$4 sm:$0xff]  }
  0x99   :  { %2038 = vmatpush1.bf16.msra.mxu0 %v5768_v22  ;;  %v5858_v22 = vld [vmem:[#allocation5 + $0x258] ss:$48 sps:$4 sm:$0xff]  }
  0x9a   :  { %2011 = vmatpush2.bf16.msra.mxu1 %v5765_v21  ;;  %2039 = vmatprep.subr.bf16.mxu0 %v5776_v24  ;;  %v5855_v21 = vld [vmem:[#allocation5 + $0x550] ss:$48 sps:$4 sm:$0xff]   ;;  %v5866_v24 = vld [vmem:[#allocation5 + $0x1fc] ss:$48 sps:$4 sm:$0xff]  }
  0x9b   :  { %2012 = vmatprep.subr.bf16.mxu1 %v5773_v23  ;;  %v5863_v23 = vld [vmem:[#allocation5 + $0x4f4] ss:$48 sps:$4 sm:$0xff]  }
  0x9d   :  { %2040 = vmatpush1.bf16.msra.mxu0 %v5774_v26  ;;  %v5864_v26 = vld [vmem:[#allocation5 + $0x1f8] ss:$48 sps:$4 sm:$0xff]  }
  0x9e   :  { %2013 = vmatpush2.bf16.msra.mxu1 %v5771_v25  ;;  %2041 = vmatprep.subr.bf16.mxu0 %v5782_v28  ;;  %v5861_v25 = vld [vmem:[#allocation5 + $0x4f0] ss:$48 sps:$4 sm:$0xff]   ;;  %v5872_v28 = vld [vmem:[#allocation5 + $0x19c] ss:$48 sps:$4 sm:$0xff]  }
  0x9f   :  { %2014 = vmatprep.subr.bf16.mxu1 %v5779_v27  ;;  %v5869_v27 = vld [vmem:[#allocation5 + $0x494] ss:$48 sps:$4 sm:$0xff]  }
  0xa1   :  { %2042 = vmatpush1.bf16.msra.mxu0 %v5780_v30  ;;  %v5870_v30 = vld [vmem:[#allocation5 + $0x198] ss:$48 sps:$4 sm:$0xff]  }
  0xa2   :  { %2015 = vmatpush2.bf16.msra.mxu1 %v5777_v29  ;;  %2043 = vmatprep.subr.bf16.mxu0 %v5788_v32  ;;  %v5867_v29 = vld [vmem:[#allocation5 + $0x490] ss:$48 sps:$4 sm:$0xff]   ;;  %v5878_v32 = vld [vmem:[#allocation5 + $0x13c] ss:$48 sps:$4 sm:$0xff]  }
  0xa3   :  { %2016 = vmatprep.subr.bf16.mxu1 %v5785_v31  ;;  %v5875_v31 = vld [vmem:[#allocation5 + $0x434] ss:$48 sps:$4 sm:$0xff]  }
  0xa5   :  { %2044 = vmatpush1.bf16.msra.mxu0 %v5786_v34  ;;  %v5876_v34 = vld [vmem:[#allocation5 + $0x138] ss:$48 sps:$4 sm:$0xff]  }
  0xa6   :  { %2017 = vmatpush2.bf16.msra.mxu1 %v5783_v33  ;;  %2045 = vmatprep.subr.bf16.mxu0 %v5794_v36  ;;  %v5873_v33 = vld [vmem:[#allocation5 + $0x430] ss:$48 sps:$4 sm:$0xff]   ;;  %v5884_v36 = vld [vmem:[#allocation5 + $0xdc] ss:$48 sps:$4 sm:$0xff]  }
  0xa7   :  { %2018 = vmatprep.subr.bf16.mxu1 %v5791_v35  ;;  %v5881_v35 = vld [vmem:[#allocation5 + $0x3d4] ss:$48 sps:$4 sm:$0xff]  }
  0xa9   :  { %2046 = vmatpush1.bf16.msra.mxu0 %v5792_v39  ;;  %v5882_v39 = vld [vmem:[#allocation5 + $0xd8] ss:$48 sps:$4 sm:$0xff]  }
  0xaa   :  { %2019 = vmatpush2.bf16.msra.mxu1 %v5789_v38  ;;  %2047 = vmatprep.subr.bf16.mxu0 %v5800_v41  ;;  %v5879_v38 = vld [vmem:[#allocation5 + $0x3d0] ss:$48 sps:$4 sm:$0xff]   ;;  %v5890_v41 = vld [vmem:[#allocation5 + $0x7c] ss:$48 sps:$4 sm:$0xff]  }
  0xab   :  { %2020 = vmatprep.subr.bf16.mxu1 %v5797_v40  ;;  %v5887_v40 = vld [vmem:[#allocation5 + $0x374] ss:$48 sps:$4 sm:$0xff]  }
  0xad   :  { %2048 = vmatpush1.bf16.msra.mxu0 %v5798_v43  ;;  %v5888_v43 = vld [vmem:[#allocation5 + $0x78] ss:$48 sps:$4 sm:$0xff]  }
  0xae   :  { %2021 = vmatpush2.bf16.msra.mxu1 %v5795_v42  ;;  %2076 = vmatprep.subr.bf16.mxu0 %v5803_v44  ;;  %v5885_v42 = vld [vmem:[#allocation5 + $0x370] ss:$48 sps:$4 sm:$0xff]   ;;  %v5893_v44 = vld [vmem:[#allocation5 + $0x314] ss:$48 sps:$4 sm:$0xff]  }
  0xaf   :  { %2119 = vmatprep.subr.bf16.mxu1 %v5806_v45  ;;  %v5896_v45 = vld [vmem:[#allocation5 + $0x1c] ss:$48 sps:$4 sm:$0xff]  }
  0xb0   :  { %2066 = vmatmul.mubr.bf16.vlgmr.msra.gmra.mxu0 %v6698_v37 }
  0xb1   :  { %2023 = vmatmul.mubr.bf16.vlgmr.msra.gmra.mxu1 %v6705_v12  ;;  %2077 = vmatpush1.bf16.msra.mxu0 %v5801_v46  ;;  %v5891_v46 = vld [vmem:[#allocation5 + $0x310] ss:$48 sps:$4 sm:$0xff]  }
  0xb2   :  { %2120 = vmatpush1.bf16.msra.mxu1 %v5804_v47  ;;  %2078 = vmatprep.subr.bf16.mxu0 %v5809_v48  ;;  %v5894_v47 = vld [vmem:[#allocation5 + $0x18] ss:$48 sps:$4 sm:$0xff]   ;;  %v5899_v48 = vld [vmem:[#allocation5 + $0x5bc] ss:$48 sps:$4 sm:$0xff]  }
  0xb3   :  { %2121 = vmatprep.subr.bf16.mxu1 %v5812_v49  ;;  %2151 = vmatprep.mubr.bf16.mxu1 %v6636_v0  ;;  %v5902_v49 = vld [vmem:[#allocation5 + $0x8bc] ss:$48 sps:$4 sm:$0xff]  }
  0xb4   :  { %2108 = vmatprep.mubr.bf16.mxu0 %v6701_v54 }
  0xb5   :  { %2079 = vmatpush1.bf16.msra.mxu0 %v5807_v50  ;;  %v5897_v50 = vld [vmem:[#allocation5 + $0x5b8] ss:$48 sps:$4 sm:$0xff]  }
  0xb6   :  { %2122 = vmatpush1.bf16.msra.mxu1 %v5810_v51  ;;  %2080 = vmatprep.subr.bf16.mxu0 %v5815_v52  ;;  %v5900_v51 = vld [vmem:[#allocation5 + $0x8b8] ss:$48 sps:$4 sm:$0xff]   ;;  %v5905_v52 = vld [vmem:[#allocation5 + $0x55c] ss:$48 sps:$4 sm:$0xff]  }
  0xb7   :  { %2123 = vmatprep.subr.bf16.mxu1 %v5818_v53  ;;  %v5908_v53 = vld [vmem:[#allocation5 + $0x85c] ss:$48 sps:$4 sm:$0xff]  }
  0xb9   :  { %2081 = vmatpush1.bf16.msra.mxu0 %v5813_v55  ;;  %v5903_v55 = vld [vmem:[#allocation5 + $0x558] ss:$48 sps:$4 sm:$0xff]  }
  0xba   :  { %2124 = vmatpush1.bf16.msra.mxu1 %v5816_v56  ;;  %2082 = vmatprep.subr.bf16.mxu0 %v5821_v57  ;;  %v5906_v56 = vld [vmem:[#allocation5 + $0x858] ss:$48 sps:$4 sm:$0xff]   ;;  %v5911_v57 = vld [vmem:[#allocation5 + $0x4fc] ss:$48 sps:$4 sm:$0xff]  }
  0xbb   :  { %2125 = vmatprep.subr.bf16.mxu1 %v5824_v58  ;;  %v5914_v58 = vld [vmem:[#allocation5 + $0x7fc] ss:$48 sps:$4 sm:$0xff]  }
  0xbd   :  { %2083 = vmatpush1.bf16.msra.mxu0 %v5819_v59  ;;  %v5909_v59 = vld [vmem:[#allocation5 + $0x4f8] ss:$48 sps:$4 sm:$0xff]  }
  0xbe   :  { %2126 = vmatpush1.bf16.msra.mxu1 %v5822_v60  ;;  %2084 = vmatprep.subr.bf16.mxu0 %v5827_v61  ;;  %v5912_v60 = vld [vmem:[#allocation5 + $0x7f8] ss:$48 sps:$4 sm:$0xff]   ;;  %v5917_v61 = vld [vmem:[#allocation5 + $0x49c] ss:$48 sps:$4 sm:$0xff]  }
  0xbf   :  { %2127 = vmatprep.subr.bf16.mxu1 %v5830_v62  ;;  %v5920_v62 = vld [vmem:[#allocation5 + $0x79c] ss:$48 sps:$4 sm:$0xff]  }
  0xc1   :  { %2085 = vmatpush1.bf16.msra.mxu0 %v5825_v63  ;;  %v5915_v63 = vld [vmem:[#allocation5 + $0x498] ss:$48 sps:$4 sm:$0xff]  }
  0xc2   :  { %2128 = vmatpush1.bf16.msra.mxu1 %v5828_v1  ;;  %2086 = vmatprep.subr.bf16.mxu0 %v5833_v2  ;;  %v5918_v1 = vld [vmem:[#allocation5 + $0x798] ss:$48 sps:$4 sm:$0xff]   ;;  %v5923_v2 = vld [vmem:[#allocation5 + $0x43c] ss:$48 sps:$4 sm:$0xff]  }
  0xc3   :  { %2129 = vmatprep.subr.bf16.mxu1 %v5836_v3  ;;  %v5926_v3 = vld [vmem:[#allocation5 + $0x73c] ss:$48 sps:$4 sm:$0xff]  }
  0xc5   :  { %2087 = vmatpush1.bf16.msra.mxu0 %v5831_v4  ;;  %v5921_v4 = vld [vmem:[#allocation5 + $0x438] ss:$48 sps:$4 sm:$0xff]  }
  0xc6   :  { %2130 = vmatpush1.bf16.msra.mxu1 %v5834_v5  ;;  %2088 = vmatprep.subr.bf16.mxu0 %v5839_v6  ;;  %v5924_v5 = vld [vmem:[#allocation5 + $0x738] ss:$48 sps:$4 sm:$0xff]   ;;  %v5929_v6 = vld [vmem:[#allocation5 + $0x3dc] ss:$48 sps:$4 sm:$0xff]  }
  0xc7   :  { %2131 = vmatprep.subr.bf16.mxu1 %v5842_v7  ;;  %v5932_v7 = vld [vmem:[#allocation5 + $0x6dc] ss:$48 sps:$4 sm:$0xff]  }
  0xc9   :  { %2089 = vmatpush1.bf16.msra.mxu0 %v5837_v8  ;;  %v5927_v8 = vld [vmem:[#allocation5 + $0x3d8] ss:$48 sps:$4 sm:$0xff]  }
  0xca   :  { %2132 = vmatpush1.bf16.msra.mxu1 %v5840_v9  ;;  %2090 = vmatprep.subr.bf16.mxu0 %v5845_v10  ;;  %v5930_v9 = vld [vmem:[#allocation5 + $0x6d8] ss:$48 sps:$4 sm:$0xff]   ;;  %v5935_v10 = vld [vmem:[#allocation5 + $0x37c] ss:$48 sps:$4 sm:$0xff]  }
  0xcb   :  { %2133 = vmatprep.subr.bf16.mxu1 %v5848_v11  ;;  %v5938_v11 = vld [vmem:[#allocation5 + $0x67c] ss:$48 sps:$4 sm:$0xff]  }
  0xcd   :  { %2091 = vmatpush1.bf16.msra.mxu0 %v5843_v13  ;;  %v5933_v13 = vld [vmem:[#allocation5 + $0x378] ss:$48 sps:$4 sm:$0xff]  }
  0xce   :  { %2134 = vmatpush1.bf16.msra.mxu1 %v5846_v14  ;;  %2092 = vmatprep.subr.bf16.mxu0 %v5851_v15  ;;  %v5936_v14 = vld [vmem:[#allocation5 + $0x678] ss:$48 sps:$4 sm:$0xff]   ;;  %v5941_v15 = vld [vmem:[#allocation5 + $0x31c] ss:$48 sps:$4 sm:$0xff]  }
  0xcf   :  { %2162 = vmatprep.subr.bf16.mxu1 %v5854_v16  ;;  %v5944_v16 = vld [vmem:[#allocation5 + $0x61c] ss:$48 sps:$4 sm:$0xff]  }
  0xd1   :  { %2152 = vmatmul.mubr.bf16.vlgmr.msra.gmra.mxu1 %v6698_v37  ;;  %2093 = vmatpush2.bf16.msra.mxu0 %v5849_v17  ;;  %v5939_v17 = vld [vmem:[#allocation5 + $0x318] ss:$48 sps:$4 sm:$0xff]  }
  0xd2   :  { %2163 = vmatpush1.bf16.msra.mxu1 %v5852_v18  ;;  %2094 = vmatprep.subr.bf16.mxu0 %v5857_v19  ;;  %v5942_v18 = vld [vmem:[#allocation5 + $0x618] ss:$48 sps:$4 sm:$0xff]   ;;  %v5947_v19 = vld [vmem:[#allocation5 + $0x2c4] ss:$48 sps:$4 sm:$0xff]  }
  0xd3   :  { %2164 = vmatprep.subr.bf16.mxu1 %v5860_v20  ;;  %2194 = vmatprep.mubr.bf16.mxu1 %v6701_v54  ;;  %v5950_v20 = vld [vmem:[#allocation5 + $0x8c4] ss:$48 sps:$4 sm:$0xff]  }
  0xd5   :  { %2095 = vmatpush2.bf16.msra.mxu0 %v5855_v21  ;;  %v5945_v21 = vld [vmem:[#allocation5 + $0x2c0] ss:$48 sps:$4 sm:$0xff]  }
  0xd6   :  { %2165 = vmatpush1.bf16.msra.mxu1 %v5858_v22  ;;  %2096 = vmatprep.subr.bf16.mxu0 %v5863_v23  ;;  %v5948_v22 = vld [vmem:[#allocation5 + $0x8c0] ss:$48 sps:$4 sm:$0xff]   ;;  %v5953_v23 = vld [vmem:[#allocation5 + $0x264] ss:$48 sps:$4 sm:$0xff]  }
  0xd7   :  { %2166 = vmatprep.subr.bf16.mxu1 %v5866_v24  ;;  %v5956_v24 = vld [vmem:[#allocation5 + $0x864] ss:$48 sps:$4 sm:$0xff]  }
  0xd9   :  { %2097 = vmatpush2.bf16.msra.mxu0 %v5861_v25  ;;  %v5951_v25 = vld [vmem:[#allocation5 + $0x260] ss:$48 sps:$4 sm:$0xff]  }
  0xda   :  { %2167 = vmatpush1.bf16.msra.mxu1 %v5864_v26  ;;  %2098 = vmatprep.subr.bf16.mxu0 %v5869_v27  ;;  %v5954_v26 = vld [vmem:[#allocation5 + $0x860] ss:$48 sps:$4 sm:$0xff]   ;;  %v5959_v27 = vld [vmem:[#allocation5 + $0x204] ss:$48 sps:$4 sm:$0xff]  }
  0xdb   :  { %2168 = vmatprep.subr.bf16.mxu1 %v5872_v28  ;;  %v5962_v28 = vld [vmem:[#allocation5 + $0x804] ss:$48 sps:$4 sm:$0xff]  }
  0xdd   :  { %2099 = vmatpush2.bf16.msra.mxu0 %v5867_v29  ;;  %v5957_v29 = vld [vmem:[#allocation5 + $0x200] ss:$48 sps:$4 sm:$0xff]  }
  0xde   :  { %2169 = vmatpush1.bf16.msra.mxu1 %v5870_v30  ;;  %2100 = vmatprep.subr.bf16.mxu0 %v5875_v31  ;;  %v5960_v30 = vld [vmem:[#allocation5 + $0x800] ss:$48 sps:$4 sm:$0xff]   ;;  %v5965_v31 = vld [vmem:[#allocation5 + $0x1a4] ss:$48 sps:$4 sm:$0xff]  }
  0xdf   :  { %2170 = vmatprep.subr.bf16.mxu1 %v5878_v32  ;;  %v5968_v32 = vld [vmem:[#allocation5 + $0x7a4] ss:$48 sps:$4 sm:$0xff]  }
  0xe1   :  { %2101 = vmatpush2.bf16.msra.mxu0 %v5873_v33  ;;  %v5963_v33 = vld [vmem:[#allocation5 + $0x1a0] ss:$48 sps:$4 sm:$0xff]  }
  0xe2   :  { %2171 = vmatpush1.bf16.msra.mxu1 %v5876_v34  ;;  %2102 = vmatprep.subr.bf16.mxu0 %v5881_v35  ;;  %v5966_v34 = vld [vmem:[#allocation5 + $0x7a0] ss:$48 sps:$4 sm:$0xff]   ;;  %v5971_v35 = vld [vmem:[#allocation5 + $0x144] ss:$48 sps:$4 sm:$0xff]  }
  0xe3   :  { %2172 = vmatprep.subr.bf16.mxu1 %v5884_v36  ;;  %v5974_v36 = vld [vmem:[#allocation5 + $0x744] ss:$48 sps:$4 sm:$0xff]  }
  0xe5   :  { %2103 = vmatpush2.bf16.msra.mxu0 %v5879_v38  ;;  %v5969_v38 = vld [vmem:[#allocation5 + $0x140] ss:$48 sps:$4 sm:$0xff]  }
  0xe6   :  { %2173 = vmatpush1.bf16.msra.mxu1 %v5882_v39  ;;  %2104 = vmatprep.subr.bf16.mxu0 %v5887_v40  ;;  %v5972_v39 = vld [vmem:[#allocation5 + $0x740] ss:$48 sps:$4 sm:$0xff]   ;;  %v5977_v40 = vld [vmem:[#allocation5 + $0xe4] ss:$48 sps:$4 sm:$0xff]  }
  0xe7   :  { %2174 = vmatprep.subr.bf16.mxu1 %v5890_v41  ;;  %v5980_v41 = vld [vmem:[#allocation5 + $0x6e4] ss:$48 sps:$4 sm:$0xff]  }
  0xe9   :  { %2105 = vmatpush2.bf16.msra.mxu0 %v5885_v42  ;;  %v5975_v42 = vld [vmem:[#allocation5 + $0xe0] ss:$48 sps:$4 sm:$0xff]  }
  0xea   :  { %2175 = vmatpush1.bf16.msra.mxu1 %v5888_v43  ;;  %2106 = vmatprep.subr.bf16.mxu0 %v5893_v44  ;;  %v5978_v43 = vld [vmem:[#allocation5 + $0x6e0] ss:$48 sps:$4 sm:$0xff]   ;;  %v5983_v44 = vld [vmem:[#allocation5 + $0x84] ss:$48 sps:$4 sm:$0xff]  }
  0xeb   :  { %2176 = vmatprep.subr.bf16.mxu1 %v5896_v45  ;;  %v5986_v45 = vld [vmem:[#allocation5 + $0x684] ss:$48 sps:$4 sm:$0xff]  }
  0xed   :  { %2107 = vmatpush2.bf16.msra.mxu0 %v5891_v46  ;;  %v5981_v46 = vld [vmem:[#allocation5 + $0x80] ss:$48 sps:$4 sm:$0xff]  }
  0xee   :  { %2177 = vmatpush1.bf16.msra.mxu1 %v5894_v47  ;;  %2205 = vmatprep.subr.bf16.mxu0 %v5902_v49  ;;  %v5984_v47 = vld [vmem:[#allocation5 + $0x680] ss:$48 sps:$4 sm:$0xff]   ;;  %v5992_v49 = vld [vmem:[#allocation5 + $0x624] ss:$48 sps:$4 sm:$0xff]  }
  0xef   :  { %2178 = vmatprep.subr.bf16.mxu1 %v5899_v48  ;;  %v5989_v48 = vld [vmem:[#allocation5 + $0x24] ss:$48 sps:$4 sm:$0xff]  }
  0xf0   :  { %2109 = vmatmul.mubr.bf16.vlgmr.msra.gmra.mxu0 %v6705_v12 }
  0xf1   :  { %2206 = vmatpush1.bf16.msra.mxu0 %v5900_v51  ;;  %2237 = vmatprep.mubr.bf16.mxu0 %v6636_v0  ;;  %v5990_v51 = vld [vmem:[#allocation5 + $0x620] ss:$48 sps:$4 sm:$0xff]  }
  0xf2   :  { %2179 = vmatpush2.bf16.msra.mxu1 %v5897_v50  ;;  %2207 = vmatprep.subr.bf16.mxu0 %v5908_v53  ;;  %v5987_v50 = vld [vmem:[#allocation5 + $0x20] ss:$48 sps:$4 sm:$0xff]   ;;  %v5998_v53 = vld [vmem:[#allocation5 + $0x2cc] ss:$48 sps:$4 sm:$0xff]  }
  0xf3   :  { %2180 = vmatprep.subr.bf16.mxu1 %v5905_v52  ;;  %v5995_v52 = vld [vmem:[#allocation5 + $0x5c4] ss:$48 sps:$4 sm:$0xff]  }
  0xf5   :  { %2208 = vmatpush1.bf16.msra.mxu0 %v5906_v56  ;;  %v5996_v56 = vld [vmem:[#allocation5 + $0x2c8] ss:$48 sps:$4 sm:$0xff]  }
  0xf6   :  { %2181 = vmatpush2.bf16.msra.mxu1 %v5903_v55  ;;  %2209 = vmatprep.subr.bf16.mxu0 %v5914_v58  ;;  %v5993_v55 = vld [vmem:[#allocation5 + $0x5c0] ss:$48 sps:$4 sm:$0xff]   ;;  %v6004_v58 = vld [vmem:[#allocation5 + $0x26c] ss:$48 sps:$4 sm:$0xff]  }
  0xf7   :  { %2182 = vmatprep.subr.bf16.mxu1 %v5911_v57  ;;  %v6001_v57 = vld [vmem:[#allocation5 + $0x564] ss:$48 sps:$4 sm:$0xff]  }
  0xf9   :  { %2210 = vmatpush1.bf16.msra.mxu0 %v5912_v60  ;;  %v6002_v60 = vld [vmem:[#allocation5 + $0x268] ss:$48 sps:$4 sm:$0xff]  }
  0xfa   :  { %2183 = vmatpush2.bf16.msra.mxu1 %v5909_v59  ;;  %2211 = vmatprep.subr.bf16.mxu0 %v5920_v62  ;;  %v5999_v59 = vld [vmem:[#allocation5 + $0x560] ss:$48 sps:$4 sm:$0xff]   ;;  %v6010_v62 = vld [vmem:[#allocation5 + $0x20c] ss:$48 sps:$4 sm:$0xff]  }
  0xfb   :  { %2184 = vmatprep.subr.bf16.mxu1 %v5917_v61  ;;  %v6007_v61 = vld [vmem:[#allocation5 + $0x504] ss:$48 sps:$4 sm:$0xff]  }
  0xfd   :  { %2212 = vmatpush1.bf16.msra.mxu0 %v5918_v1  ;;  %v6008_v1 = vld [vmem:[#allocation5 + $0x208] ss:$48 sps:$4 sm:$0xff]  }
  0xfe   :  { %2185 = vmatpush2.bf16.msra.mxu1 %v5915_v63  ;;  %2213 = vmatprep.subr.bf16.mxu0 %v5926_v3  ;;  %v6005_v63 = vld [vmem:[#allocation5 + $0x500] ss:$48 sps:$4 sm:$0xff]   ;;  %v6016_v3 = vld [vmem:[#allocation5 + $0x1ac] ss:$48 sps:$4 sm:$0xff]  }
  0xff   :  { %2186 = vmatprep.subr.bf16.mxu1 %v5923_v2  ;;  %v6013_v2 = vld [vmem:[#allocation5 + $0x4a4] ss:$48 sps:$4 sm:$0xff]  }
 0x101   :  { %2214 = vmatpush1.bf16.msra.mxu0 %v5924_v5  ;;  %v6014_v5 = vld [vmem:[#allocation5 + $0x1a8] ss:$48 sps:$4 sm:$0xff]  }
 0x102   :  { %2187 = vmatpush2.bf16.msra.mxu1 %v5921_v4  ;;  %2215 = vmatprep.subr.bf16.mxu0 %v5932_v7  ;;  %v6011_v4 = vld [vmem:[#allocation5 + $0x4a0] ss:$48 sps:$4 sm:$0xff]   ;;  %v6022_v7 = vld [vmem:[#allocation5 + $0x14c] ss:$48 sps:$4 sm:$0xff]  }
 0x103   :  { %2188 = vmatprep.subr.bf16.mxu1 %v5929_v6  ;;  %v6019_v6 = vld [vmem:[#allocation5 + $0x444] ss:$48 sps:$4 sm:$0xff]  }
 0x105   :  { %2216 = vmatpush1.bf16.msra.mxu0 %v5930_v9  ;;  %v6025_v9 = vld [vmem:[#allocation5 + $0x3e4] ss:$48 sps:$4 sm:$0xff]  }
 0x106   :  { %2189 = vmatpush2.bf16.msra.mxu1 %v5927_v8  ;;  %2217 = vmatprep.subr.bf16.mxu0 %v5938_v11  ;;  %v6017_v8 = vld [vmem:[#allocation5 + $0x440] ss:$48 sps:$4 sm:$0xff]  }
 0x107   :  { %2190 = vmatprep.subr.bf16.mxu1 %v5935_v10  ;;  %v6028_v10 = vld [vmem:[#allocation5 + $0xec] ss:$48 sps:$4 sm:$0xff]   ;;  %v6023_v11 = vld [vmem:[#allocation5 + $0x3e0] ss:$48 sps:$4 sm:$0xff]  }
 0x109   :  { %2218 = vmatpush1.bf16.msra.mxu0 %v5936_v14  ;;  %v6031_v14 = vld [vmem:[#allocation5 + $0x384] ss:$48 sps:$4 sm:$0xff]  }
 0x10a   :  { %2191 = vmatpush2.bf16.msra.mxu1 %v5933_v13  ;;  %2219 = vmatprep.subr.bf16.mxu0 %v5944_v16  ;;  %v6026_v13 = vld [vmem:[#allocation5 + $0xe8] ss:$48 sps:$4 sm:$0xff]   ;;  %v6034_v16 = vld [vmem:[#allocation5 + $0x8c] ss:$48 sps:$4 sm:$0xff]  }
 0x10b   :  { %2192 = vmatprep.subr.bf16.mxu1 %v5941_v15  ;;  %v404_v15 = vlaneseq }
 0x10d   :  { %2220 = vmatpush1.bf16.msra.mxu0 %v5942_v18  ;;  %v6032_v18 = vld [vmem:[#allocation5 + $0x88] ss:$48 sps:$4 sm:$0xff]  }
 0x10e   :  { %2193 = vmatpush2.bf16.msra.mxu1 %v5939_v17  ;;  %2248 = vmatprep.subr.bf16.mxu0 %v5947_v19  ;;  %v6029_v17 = vld [vmem:[#allocation5 + $0x380] ss:$48 sps:$4 sm:$0xff]   ;;  %v6037_v19 = vld [vmem:[#allocation5 + $0x324] ss:$48 sps:$4 sm:$0xff]  }
 0x10f   :  { %2291 = vmatprep.subr.bf16.mxu1 %v5950_v20  ;;  %v6723_v20 = vshrl.u32 %v404_v15, 7  ;;  %v6083_v15 = vld [vmem:[#allocation5 + $0x328] ss:$48 sps:$4 sm:$0xff]  }
 0x110   :  { %2238 = vmatmul.mubr.bf16.vlgmr.msra.gmra.mxu0 %v6698_v37 }
 0x111   :  { %2195 = vmatmul.mubr.bf16.vlgmr.msra.gmra.mxu1 %v6705_v12  ;;  %2249 = vmatpush1.bf16.msra.mxu0 %v5945_v21  ;;  %v6040_v21 = vld [vmem:[#allocation5 + $0x2c] ss:$48 sps:$4 sm:$0xff]  }
 0x112   :  { %2292 = vmatpush1.bf16.msra.mxu1 %v5948_v22  ;;  %2250 = vmatprep.subr.bf16.mxu0 %v5953_v23  ;;  %v6035_v22 = vld [vmem:[#allocation5 + $0x320] ss:$48 sps:$4 sm:$0xff]   ;;  %v6038_v23 = vld [vmem:[#allocation5 + $0x28] ss:$48 sps:$4 sm:$0xff]  }
 0x113   :  { %2293 = vmatprep.subr.bf16.mxu1 %v5956_v24  ;;  %2323 = vmatprep.mubr.bf16.mxu1 %v6636_v0  ;;  %v6725_v24 = vld [vmem:[#allocation7] sm:$0xff] }
 0x114   :  { %2280 = vmatprep.mubr.bf16.mxu0 %v6701_v54 }
 0x115   :  { %2251 = vmatpush1.bf16.msra.mxu0 %v5951_v25  ;;  %v6728_v25 = vsub.s32 0, %v6723_v20 }
 0x116   :  { %2294 = vmatpush1.bf16.msra.mxu1 %v5954_v26  ;;  %2252 = vmatprep.subr.bf16.mxu0 %v5959_v27  ;;  %v6043_v26 = vld [vmem:[#allocation5 + $0x5cc] ss:$48 sps:$4 sm:$0xff]  }
 0x117   :  { %2295 = vmatprep.subr.bf16.mxu1 %v5962_v28  ;;  %v6046_v27 = vld [vmem:[#allocation5 + $0x8cc] ss:$48 sps:$4 sm:$0xff]   ;;  %v6041_v28 = vld [vmem:[#allocation5 + $0x5c8] ss:$48 sps:$4 sm:$0xff]  }
 0x119   :  { %2253 = vmatpush1.bf16.msra.mxu0 %v5957_v29  ;;  %v407_v29 = vrot.slane %v6725_v24, %v6728_v25 }
 0x11a   :  { %2296 = vmatpush1.bf16.msra.mxu1 %v5960_v30  ;;  %2254 = vmatprep.subr.bf16.mxu0 %v5965_v31  ;;  %v6044_v30 = vld [vmem:[#allocation5 + $0x8c8] ss:$48 sps:$4 sm:$0xff]   ;;  %v6049_v31 = vld [vmem:[#allocation5 + $0x56c] ss:$48 sps:$4 sm:$0xff]  }
 0x11b   :  { %2297 = vmatprep.subr.bf16.mxu1 %v5968_v32 }
 0x11d   :  { %2255 = vmatpush1.bf16.msra.mxu0 %v5963_v33  ;;  %v6052_v33 = vld [vmem:[#allocation5 + $0x86c] ss:$48 sps:$4 sm:$0xff]  }
 0x11e   :  { %2298 = vmatpush1.bf16.msra.mxu1 %v5966_v34  ;;  %2256 = vmatprep.subr.bf16.mxu0 %v5971_v35  ;;  %v6047_v35 = vld [vmem:[#allocation5 + $0x568] ss:$48 sps:$4 sm:$0xff]  }
 0x11f   :  { %2299 = vmatprep.subr.bf16.mxu1 %v5974_v36  ;;  %v6050_v36 = vld [vmem:[#allocation5 + $0x868] ss:$48 sps:$4 sm:$0xff]  }
 0x121   :  { %2257 = vmatpush1.bf16.msra.mxu0 %v5969_v38 }
 0x122   :  { %2300 = vmatpush1.bf16.msra.mxu1 %v5972_v39  ;;  %2258 = vmatprep.subr.bf16.mxu0 %v5977_v40  ;;  %v6055_v39 = vld [vmem:[#allocation5 + $0x50c] ss:$48 sps:$4 sm:$0xff]  }
 0x123   :  { %2301 = vmatprep.subr.bf16.mxu1 %v5980_v41  ;;  %v6058_v40 = vld [vmem:[#allocation5 + $0x80c] ss:$48 sps:$4 sm:$0xff]  }
 0x125   :  { %2259 = vmatpush1.bf16.msra.mxu0 %v5975_v42 }
 0x126   :  { %2302 = vmatpush1.bf16.msra.mxu1 %v5978_v43  ;;  %2260 = vmatprep.subr.bf16.mxu0 %v5983_v44  ;;  %v6053_v44 = vld [vmem:[#allocation5 + $0x508] ss:$48 sps:$4 sm:$0xff]  }
 0x127   :  { %2303 = vmatprep.subr.bf16.mxu1 %v5986_v45  ;;  %v6056_v45 = vld [vmem:[#allocation5 + $0x808] ss:$48 sps:$4 sm:$0xff]  }
 0x129   :  { %2261 = vmatpush1.bf16.msra.mxu0 %v5981_v46 }
 0x12a   :  { %2304 = vmatpush1.bf16.msra.mxu1 %v5984_v47  ;;  %2262 = vmatprep.subr.bf16.mxu0 %v5989_v48  ;;  %v6061_v47 = vld [vmem:[#allocation5 + $0x4ac] ss:$48 sps:$4 sm:$0xff]  }
 0x12b   :  { %2305 = vmatprep.subr.bf16.mxu1 %v5992_v49  ;;  %v6064_v48 = vld [vmem:[#allocation5 + $0x7ac] ss:$48 sps:$4 sm:$0xff]  }
 0x12d   :  { %2263 = vmatpush1.bf16.msra.mxu0 %v5987_v50 }
 0x12e   :  { %2306 = vmatpush1.bf16.msra.mxu1 %v5990_v51  ;;  %2264 = vmatprep.subr.bf16.mxu0 %v5995_v52  ;;  %v6059_v52 = vld [vmem:[#allocation5 + $0x4a8] ss:$48 sps:$4 sm:$0xff]  }
 0x12f   :  { %2334 = vmatprep.subr.bf16.mxu1 %v5998_v53  ;;  %v6062_v53 = vld [vmem:[#allocation5 + $0x7a8] ss:$48 sps:$4 sm:$0xff]  }
 0x131   :  { %2324 = vmatmul.mubr.bf16.vlgmr.msra.gmra.mxu1 %v6698_v37  ;;  %2265 = vmatpush2.bf16.msra.mxu0 %v5993_v55  ;;  %v1981_v32 = vpop.f32.mrf.mxu1  ;;  %v6067_v55 = vld [vmem:[#allocation5 + $0x44c] ss:$48 sps:$4 sm:$0xff]  }
 0x132   :  { %2335 = vmatpush1.bf16.msra.mxu1 %v5996_v56  ;;  %2266 = vmatprep.subr.bf16.mxu0 %v6001_v57  ;;  %v6070_v56 = vld [vmem:[#allocation5 + $0x74c] ss:$48 sps:$4 sm:$0xff]  }
 0x133   :  { %2336 = vmatprep.subr.bf16.mxu1 %v6004_v58  ;;  %2366 = vmatprep.mubr.bf16.mxu1 %v6701_v54  ;;  %v6020_v54 = vld [vmem:[#allocation5 + $0x148] ss:$48 sps:$4 sm:$0xff]   ;;  %v1983_v41 = vpop.f32.mrf.mxu1 }
 0x135   :  { %2267 = vmatpush2.bf16.msra.mxu0 %v5999_v59  ;;  %v1985_v50 = vpop.f32.mrf.mxu1  ;;  %v6065_v59 = vld [vmem:[#allocation5 + $0x448] ss:$48 sps:$4 sm:$0xff]  }
 0x136   :  { %2337 = vmatpush1.bf16.msra.mxu1 %v6002_v60  ;;  %2268 = vmatprep.subr.bf16.mxu0 %v6007_v61  ;;  %v6068_v60 = vld [vmem:[#allocation5 + $0x748] ss:$48 sps:$4 sm:$0xff]   ;;  %v6073_v61 = vld [vmem:[#allocation5 + $0x3ec] ss:$48 sps:$4 sm:$0xff]  }
 0x137   :  { %2338 = vmatprep.subr.bf16.mxu1 %v6010_v62  ;;  %v6076_v62 = vld [vmem:[#allocation5 + $0x6ec] ss:$48 sps:$4 sm:$0xff]  }
 0x139   :  { %2269 = vmatpush2.bf16.msra.mxu0 %v6005_v63  ;;  %v6737_v63 = vsub.s32 1, %v6723_v20 }
 0x13a   :  { %2339 = vmatpush1.bf16.msra.mxu1 %v6008_v1  ;;  %2270 = vmatprep.subr.bf16.mxu0 %v6013_v2  ;;  %v6071_v1 = vld [vmem:[#allocation5 + $0x3e8] ss:$48 sps:$4 sm:$0xff]  }
 0x13b   :  { %2340 = vmatprep.subr.bf16.mxu1 %v6016_v3  ;;  %v6074_v3 = vld [vmem:[#allocation5 + $0x6e8] ss:$48 sps:$4 sm:$0xff]  }
 0x13d   :  { %2271 = vmatpush2.bf16.msra.mxu0 %v6011_v4  ;;  %v411_v4 = vrot.slane %v6725_v24, %v6737_v63 }
 0x13e   :  { %2341 = vmatpush1.bf16.msra.mxu1 %v6014_v5  ;;  %2272 = vmatprep.subr.bf16.mxu0 %v6019_v6  ;;  %v6079_v5 = vld [vmem:[#allocation5 + $0x38c] ss:$48 sps:$4 sm:$0xff]  }
 0x13f   :  { %2342 = vmatprep.subr.bf16.mxu1 %v6022_v7  ;;  %v6082_v6 = vld [vmem:[#allocation5 + $0x68c] ss:$48 sps:$4 sm:$0xff]  }
 0x141   :  { %2273 = vmatpush2.bf16.msra.mxu0 %v6017_v8  ;;  %v6077_v8 = vld [vmem:[#allocation5 + $0x388] ss:$48 sps:$4 sm:$0xff]  }
 0x142   :  { %2343 = vmatpush1.bf16.msra.mxu1 %v6020_v54  ;;  %2274 = vmatprep.subr.bf16.mxu0 %v6025_v9  ;;  %v6080_v54 = vld [vmem:[#allocation5 + $0x688] ss:$48 sps:$4 sm:$0xff]  }
 0x143   :  { %2344 = vmatprep.subr.bf16.mxu1 %v6028_v10  ;;  %v1987_v10 = vpop.f32.mrf.mxu1 }
 0x145   :  { %2275 = vmatpush2.bf16.msra.mxu0 %v6023_v11  ;;  %v6085_v11 = vld [vmem:[#allocation5 + $0x32c] ss:$48 sps:$4 sm:$0xff]  }
 0x146   :  { %2345 = vmatpush1.bf16.msra.mxu1 %v6026_v13  ;;  %2276 = vmatprep.subr.bf16.mxu0 %v6031_v14  ;;  %v6088_v13 = vld [vmem:[#allocation5 + $0x62c] ss:$48 sps:$4 sm:$0xff]  }
 0x147   :  { %2346 = vmatprep.subr.bf16.mxu1 %v6034_v16  ;;  %v6086_v16 = vld [vmem:[#allocation5 + $0x628] ss:$48 sps:$4 sm:$0xff]  }
 0x149   :  { %2277 = vmatpush2.bf16.msra.mxu0 %v6029_v17 }
 0x14a   :  { %2347 = vmatpush1.bf16.msra.mxu1 %v6032_v18  ;;  %2278 = vmatprep.subr.bf16.mxu0 %v6037_v19  ;;  %v6091_v18 = vld [vmem:[#allocation8 + $0xac] ss:$12 sps:$4 sm:$0xff]  }
 0x14b   :  { %2348 = vmatprep.subr.bf16.mxu1 %v6040_v21  ;;  %v6094_v19 = vld [vmem:[#allocation8 + $0x22c] ss:$12 sps:$4 sm:$0xff]  }
 0x14d   :  { %2279 = vmatpush2.bf16.msra.mxu0 %v6035_v22  ;;  %v6089_v22 = vld [vmem:[#allocation8 + $0xa8] ss:$12 sps:$4 sm:$0xff]  }
 0x14e   :  { %2349 = vmatpush1.bf16.msra.mxu1 %v6038_v23  ;;  %2377 = vmatprep.subr.bf16.mxu0 %v6046_v27  ;;  %v418_v23 = vsub.s32 3, %v6723_v20  ;;  %v6097_v27 = vld [vmem:[#allocation8 + $0x94] ss:$12 sps:$4 sm:$0xff]  }
 0x14f   :  { %2350 = vmatprep.subr.bf16.mxu1 %v6043_v26  ;;  %v6092_v26 = vld [vmem:[#allocation8 + $0x228] ss:$12 sps:$4 sm:$0xff]  }
 0x150   :  { %v1938_v34 = vpop.f32.mrf.mxu0  ;;  %2281 = vmatmul.mubr.bf16.vlgmr.msra.gmra.mxu0 %v6705_v12 }
 0x151   :  { %v1939_v38 = vadd.f32 %v1938_v34, %v407_v29  ;;  %2378 = vmatpush1.bf16.msra.mxu0 %v6044_v30  ;;  %2409 = vmatprep.mubr.bf16.mxu0 %v6636_v0  ;;  %v419_v30 = vrot.slane %v6725_v24, %v418_v23 }
 0x152   :  { %2351 = vmatpush2.bf16.msra.mxu1 %v6041_v28  ;;  %v1940_v42 = vpop.f32.mrf.mxu0  ;;  %2379 = vmatprep.subr.bf16.mxu0 %v6052_v33 }
 0x153   :  { %2352 = vmatprep.subr.bf16.mxu1 %v6049_v31  ;;  %v1982_v43 = vadd.f32 %v1981_v32, %v1939_v38  ;;  %v1941_v9 = vadd.f32 %v1940_v42, %v411_v4  ;;  %v6095_v31 = vld [vmem:[#allocation8 + $0x90] ss:$12 sps:$4 sm:$0xff]   ;;  %v6100_v32 = vld [vmem:[#allocation8 + $0x214] ss:$12 sps:$4 sm:$0xff]  }
 0x154   :  { %v1942_v46 = vpop.f32.mrf.mxu0  ;;  %v6106_v42 = vld [vmem:[#allocation8 + $0x1fc] ss:$12 sps:$4 sm:$0xff]  }
 0x155   :  { %v1943_v49 = vadd.f32 %v1942_v46, %v407_v29  ;;  %2380 = vmatpush1.bf16.msra.mxu0 %v6050_v36  ;;  %v2420_v57 = vmax.f32 %v1982_v43, 0.0  ;;  %v1984_v17 = vadd.f32 %v1983_v41, %v1941_v9  ;;  %v6103_v36 = vld [vmem:[#allocation8 + $0x7c] ss:$12 sps:$4 sm:$0xff]   ;;  %v6101_v41 = vld [vmem:[#allocation8 + $0x78] ss:$12 sps:$4 sm:$0xff]  }
 0x156   :  { %2353 = vmatpush2.bf16.msra.mxu1 %v6047_v35  ;;  %2381 = vmatprep.subr.bf16.mxu0 %v6058_v40  ;;  %v1944_v2 = vpop.f32.mrf.mxu0  ;;  %v6098_v35 = vld [vmem:[#allocation8 + $0x210] ss:$12 sps:$4 sm:$0xff]   ;;  %v6134_v9 = vld [vmem:[#allocation8 + $0x180] ss:$12 sps:$4 sm:$0xff]  }
 0x157   :  { %2354 = vmatprep.subr.bf16.mxu1 %v6055_v39  ;;  %v1986_v51 = vadd.f32 %v1985_v50, %v1943_v49  ;;  %v1945_v7 = vadd.f32 %v1944_v2, %v411_v4  ;;  %v2421_v28 = vmax.f32 %v1984_v17, 0.0  ;;  %v6109_v46 = vld [vmem:[#allocation8 + $0x64] ss:$12 sps:$4 sm:$0xff]   ;;  %v6107_v49 = vld [vmem:[#allocation8 + $0x60] ss:$12 sps:$4 sm:$0xff]  }
 0x158   :  { %v6122_v2 = vld [vmem:[#allocation8 + $0x1b0] ss:$12 sps:$4 sm:$0xff]   ;;  %v6148_v17 = vld [vmem:[#allocation8 + $0x2d4] ss:$12 sps:$4 sm:$0xff]  }
 0x159   :  { %v2432_v58 = vmax.f32 %v1986_v51, 0.0  ;;  %2382 = vmatpush1.bf16.msra.mxu0 %v6056_v45  ;;  %v1988_v14 = vadd.f32 %v1987_v10, %v1945_v7  ;;  %v6110_v51 = vld [vmem:[#allocation8 + $0x1e0] ss:$12 sps:$4 sm:$0xff]   ;;  %v6130_v4 = vld [vmem:[#allocation8 + $0x19c] ss:$12 sps:$4 sm:$0xff]  }
 0x15a   :  { %2355 = vmatpush2.bf16.msra.mxu1 %v6053_v44  ;;  %2383 = vmatprep.subr.bf16.mxu0 %v6064_v48  ;;  %v6133_v7 = vld [vmem:[#allocation8 + $0x4] ss:$12 sps:$4 sm:$0xff]   ;;  %v6139_v10 = vld [vmem:[#allocation8 + $0x16c] ss:$12 sps:$4 sm:$0xff]  }
 0x15b   :  { %2356 = vmatprep.subr.bf16.mxu1 %v6061_v47  ;;  %v6734_v0 = vpack.c.bf16 %v2432_v58, %v2420_v57  ;;  %v2433_v21 = vmax.f32 %v1988_v14, 0.0  ;;  %v6112_v47 = vld [vmem:[#allocation8 + $0x1e4] ss:$12 sps:$4 sm:$0xff]   ;;  %v6140_v14 = vld [vmem:[#allocation8 + $0x2e8] ss:$12 sps:$4 sm:$0xff]  }
 0x15d   :  { %2384 = vmatpush1.bf16.msra.mxu0 %v6062_v53  ;;  %v6742_v29 = vpack.c.bf16 %v2433_v21, %v2421_v28  ;;  %v6115_v53 = vld [vmem:[#allocation8 + $0x4c] ss:$12 sps:$4 sm:$0xff]  }
 0x15e   :  { %2357 = vmatpush2.bf16.msra.mxu1 %v6059_v52  ;;  %2385 = vmatprep.subr.bf16.mxu0 %v6070_v56  ;;  %v6149_v21 = vld [vmem:[#allocation8 + $0x138] ss:$12 sps:$4 sm:$0xff]   ;;  %v6155_v28 = vld [vmem:[#allocation8 + $0x120] ss:$12 sps:$4 sm:$0xff]  }
 0x15f   :  { %2358 = vmatprep.subr.bf16.mxu1 %v6067_v55  ;;  %v6118_v55 = vld [vmem:[#allocation8 + $0x1cc] ss:$12 sps:$4 sm:$0xff]  }
 0x161   :  { %2386 = vmatpush1.bf16.msra.mxu0 %v6068_v60  ;;  %v6116_v60 = vld [vmem:[#allocation8 + $0x1c8] ss:$12 sps:$4 sm:$0xff]  }
 0x162   :  { %2359 = vmatpush2.bf16.msra.mxu1 %v6065_v59  ;;  %2387 = vmatprep.subr.bf16.mxu0 %v6076_v62  ;;  %v6113_v59 = vld [vmem:[#allocation8 + $0x48] ss:$12 sps:$4 sm:$0xff]  }
 0x163   :  { %2360 = vmatprep.subr.bf16.mxu1 %v6073_v61  ;;  %v6121_v61 = vld [vmem:[#allocation8 + $0x34] ss:$12 sps:$4 sm:$0xff]  }
 0x164   :  { %v6124_v62 = vld [vmem:[#allocation8 + $0x1b4] ss:$12 sps:$4 sm:$0xff]  }
 0x165   :  { %2388 = vmatpush1.bf16.msra.mxu0 %v6074_v3  ;;  %v6127_v3 = vld [vmem:[#allocation8 + $0x1c] ss:$12 sps:$4 sm:$0xff]  }
 0x166   :  { %2361 = vmatpush2.bf16.msra.mxu1 %v6071_v1  ;;  %2389 = vmatprep.subr.bf16.mxu0 %v6082_v6  ;;  %v6119_v1 = vld [vmem:[#allocation8 + $0x30] ss:$12 sps:$4 sm:$0xff]   ;;  %v6128_v6 = vld [vmem:[#allocation8 + $0x198] ss:$12 sps:$4 sm:$0xff]  }
 0x167   :  { %2362 = vmatprep.subr.bf16.mxu1 %v6079_v5  ;;  %v6125_v5 = vld [vmem:[#allocation8 + $0x18] ss:$12 sps:$4 sm:$0xff]  }
 0x169   :  { %2390 = vmatpush1.bf16.msra.mxu0 %v6080_v54  ;;  %v6131_v54 = vld [vmem:[#allocation8] ss:$12 sps:$4 sm:$0xff]  }
 0x16a   :  { %2363 = vmatpush2.bf16.msra.mxu1 %v6077_v8  ;;  %2391 = vmatprep.subr.bf16.mxu0 %v6088_v13  ;;  %v6136_v8 = vld [vmem:[#allocation8 + $0x184] ss:$12 sps:$4 sm:$0xff]   ;;  %v6137_v13 = vld [vmem:[#allocation8 + $0x168] ss:$12 sps:$4 sm:$0xff]  }
 0x16b   :  { %2364 = vmatprep.subr.bf16.mxu1 %v6085_v11  ;;  %v6142_v11 = vld [vmem:[#allocation8 + $0x2ec] ss:$12 sps:$4 sm:$0xff]  }
 0x16d   :  { %2392 = vmatpush1.bf16.msra.mxu0 %v6086_v16  ;;  %v6143_v16 = vld [vmem:[#allocation8 + $0x150] ss:$12 sps:$4 sm:$0xff]  }
 0x16e   :  { %2365 = vmatpush2.bf16.msra.mxu1 %v6083_v15  ;;  %4393 = vmatprep.subr.bf16.mxu0 %v6091_v18  ;;  %v6145_v15 = vld [vmem:[#allocation8 + $0x154] ss:$12 sps:$4 sm:$0xff]   ;;  %v6146_v18 = vld [vmem:[#allocation8 + $0x2d0] ss:$12 sps:$4 sm:$0xff]  }
 0x16f   :  { %4436 = vmatprep.subr.bf16.mxu1 %v6094_v19  ;;  %v6151_v19 = vld [vmem:[#allocation8 + $0x13c] ss:$12 sps:$4 sm:$0xff]  }
 0x170   :  { %v6749_v34 = vpop.f32.mrf.mxu0  ;;  %2410 = vmatmul.mubr.bf16.vlgmr.msra.gmra.mxu0 %v6698_v37 }
 0x171   :  { %v6747_v33 = vpop.f32.mrf.mxu1  ;;  %2367 = vmatmul.mubr.bf16.vlgmr.msra.gmra.mxu1 %v6705_v12  ;;  %4394 = vmatpush1.bf16.msra.mxu0 %v6089_v22  ;;  %v6104_v12 = vld [vmem:[#allocation8 + $0x1f8] ss:$12 sps:$4 sm:$0xff]   ;;  %v6154_v22 = vld [vmem:[#allocation8 + $0x2bc] ss:$12 sps:$4 sm:$0xff]  }
 0x172   :  { %4425 = vmatprep.mubr.bf16.mxu0 %v6742_v29  ;;  %4437 = vmatpush1.bf16.msra.mxu1 %v6092_v26  ;;  %v2069_v39 = vpop.f32.mrf.mxu0  ;;  %v6152_v26 = vld [vmem:[#allocation8 + $0x2b8] ss:$12 sps:$4 sm:$0xff]  }
 0x173   :  { %v2026_v38 = vpop.f32.mrf.mxu1  ;;  %4395 = vmatprep.subr.bf16.mxu0 %v6097_v27  ;;  %4438 = vmatprep.subr.bf16.mxu1 %v6100_v32  ;;  %v6157_v27 = vld [vmem:[#allocation8 + $0x124] ss:$12 sps:$4 sm:$0xff]   ;;  %v6163_v32 = vld [vmem:[#allocation8 + $0x10c] ss:$12 sps:$4 sm:$0xff]  }
 0x174   :  { %v2027_v40 = vadd.f32 %v2026_v38, %v419_v30  ;;  %v6756_v44 = vpop.f32.mrf.mxu0  ;;  %v6166_v38 = vld [vmem:[#allocation8 + $0x28c] ss:$12 sps:$4 sm:$0xff]  }
 0x175   :  { %v6754_v43 = vpop.f32.mrf.mxu1  ;;  %4396 = vmatpush1.bf16.msra.mxu0 %v6095_v31  ;;  %v6158_v31 = vld [vmem:[#allocation8 + $0x2a0] ss:$12 sps:$4 sm:$0xff]  }
 0x176   :  { %v2070_v37 = vadd.f32 %v2069_v39, %v2027_v40  ;;  %4439 = vmatpush1.bf16.msra.mxu1 %v6098_v35  ;;  %4397 = vmatprep.subr.bf16.mxu0 %v6103_v36  ;;  %v2073_v50 = vpop.f32.mrf.mxu0  ;;  %v6762_v35 = vsub.s32 2, %v6723_v20  ;;  %v6161_v36 = vld [vmem:[#allocation8 + $0x108] ss:$12 sps:$4 sm:$0xff]  }
 0x177   :  { %v2030_v45 = vpop.f32.mrf.mxu1  ;;  %4440 = vmatprep.subr.bf16.mxu1 %v6106_v42  ;;  %v6164_v39 = vld [vmem:[#allocation8 + $0x288] ss:$12 sps:$4 sm:$0xff]  }
 0x178   :  { %v2031_v48 = vadd.f32 %v2030_v45, %v419_v30  ;;  %v2423_v56 = vmax.f32 %v2070_v37, 0.0  ;;  %v6160_v30 = vld [vmem:[#allocation8 + $0x2a4] ss:$12 sps:$4 sm:$0xff]   ;;  %v6169_v40 = vld [vmem:[#allocation8 + $0xf4] ss:$12 sps:$4 sm:$0xff]   ;;  %v415_v42 = vrot.slane %v6725_v24, %v6762_v35 }
 0x179   :  { %4398 = vmatpush1.bf16.msra.mxu0 %v6101_v41  ;;  %v6172_v41 = vld [vmem:[#allocation8 + $0x274] ss:$12 sps:$4 sm:$0xff]   ;;  %v6170_v37 = vld [vmem:[#allocation8 + $0x270] ss:$12 sps:$4 sm:$0xff]  }
 0x17a   :  { %v2074_v52 = vadd.f32 %v2073_v50, %v2031_v48  ;;  %4441 = vmatpush1.bf16.msra.mxu1 %v6104_v12  ;;  %4399 = vmatprep.subr.bf16.mxu0 %v6109_v46  ;;  %v6167_v12 = vld [vmem:[#allocation8 + $0xf0] ss:$12 sps:$4 sm:$0xff]   ;;  %v2029_v46 = vadd.f32 %v6754_v43, %v415_v42  ;;  %v2025_v48 = vadd.f32 %v6747_v33, %v415_v42  ;;  %v6176_v50 = vld [vmem:[#allocation8 + $0x258] ss:$12 sps:$4 sm:$0xff]   ;;  %v6182_v43 = vld [vmem:[#allocation8 + $0x240] ss:$12 sps:$4 sm:$0xff]  }
 0x17b   :  { %4442 = vmatprep.subr.bf16.mxu1 %v6112_v47  ;;  %v6175_v45 = vld [vmem:[#allocation8 + $0xdc] ss:$12 sps:$4 sm:$0xff]   ;;  %v426_v33 = vsub.s32 5, %v6723_v20  ;;  %v6220_v42 = vld [vmem:[#allocation8 + $0x4b4] ss:$12 sps:$4 sm:$0xff]  }
 0x17c   :  { %v2435_v57 = vmax.f32 %v2074_v52, 0.0  ;;  %v6178_v47 = vld [vmem:[#allocation8 + $0x25c] ss:$12 sps:$4 sm:$0xff]   ;;  %v2072_v52 = vadd.f32 %v6756_v44, %v2029_v46 }
 0x17d   :  { %4400 = vmatpush1.bf16.msra.mxu0 %v6107_v49  ;;  %v6173_v49 = vld [vmem:[#allocation8 + $0xd8] ss:$12 sps:$4 sm:$0xff]   ;;  %v6188_v44 = vld [vmem:[#allocation8 + $0x528] ss:$12 sps:$4 sm:$0xff]  }
 0x17e   :  { %v6758_v58 = vpack.c.bf16 %v2435_v57, %v2423_v56  ;;  %4443 = vmatpush1.bf16.msra.mxu1 %v6110_v51  ;;  %4401 = vmatprep.subr.bf16.mxu0 %v6115_v53  ;;  %v6181_v51 = vld [vmem:[#allocation8 + $0xc4] ss:$12 sps:$4 sm:$0xff]   ;;  %v2068_v56 = vadd.f32 %v6749_v34, %v2025_v48  ;;  %v6187_v57 = vld [vmem:[#allocation8 + $0x3ac] ss:$12 sps:$4 sm:$0xff]   ;;  %v6226_v46 = vld [vmem:[#allocation8 + $0x49c] ss:$12 sps:$4 sm:$0xff]  }
 0x17f   :  { %4444 = vmatprep.subr.bf16.mxu1 %v6118_v55  ;;  %v6184_v53 = vld [vmem:[#allocation8 + $0x244] ss:$12 sps:$4 sm:$0xff]   ;;  %v6179_v55 = vld [vmem:[#allocation8 + $0xc0] ss:$12 sps:$4 sm:$0xff]  }
 0x180   :  { %4468 = vmatprep.mubr.bf16.mxu1 %v6758_v58  ;;  %v6224_v48 = vld [vmem:[#allocation8 + $0x498] ss:$12 sps:$4 sm:$0xff]  }
 0x181   :  { %4402 = vmatpush1.bf16.msra.mxu0 %v6113_v59  ;;  %v6190_v59 = vld [vmem:[#allocation8 + $0x52c] ss:$12 sps:$4 sm:$0xff]  }
 0x182   :  { %4445 = vmatpush1.bf16.msra.mxu1 %v6116_v60  ;;  %4403 = vmatprep.subr.bf16.mxu0 %v6121_v61  ;;  %v2434_v60 = vmax.f32 %v2072_v52, 0.0  ;;  %v6185_v61 = vld [vmem:[#allocation8 + $0x3a8] ss:$12 sps:$4 sm:$0xff]   ;;  %v6230_v52 = vld [vmem:[#allocation8 + $0x480] ss:$12 sps:$4 sm:$0xff]  }
 0x183   :  { %4446 = vmatprep.subr.bf16.mxu1 %v6124_v62 }
 0x185   :  { %4404 = vmatpush1.bf16.msra.mxu0 %v6119_v1  ;;  %v2422_v1 = vmax.f32 %v2068_v56, 0.0  ;;  %v434_v56 = vsub.s32 7, %v6723_v20 }
 0x186   :  { %4447 = vmatpush1.bf16.msra.mxu1 %v6122_v2  ;;  %4405 = vmatprep.subr.bf16.mxu0 %v6127_v3  ;;  %v6193_v2 = vld [vmem:[#allocation8 + $0x394] ss:$12 sps:$4 sm:$0xff]   ;;  %v427_v3 = vrot.slane %v6725_v24, %v426_v33 }
 0x187   :  { %4448 = vmatprep.subr.bf16.mxu1 %v6130_v4  ;;  %v6773_v34 = vpack.c.bf16 %v2434_v60, %v2422_v1  ;;  %v6191_v4 = vld [vmem:[#allocation8 + $0x390] ss:$12 sps:$4 sm:$0xff]   ;;  %v6473_v60 = vld [vmem:[#allocation7] sm:$0xff] }
 0x188   :  { %v435_v33 = vrot.slane %v6473_v60, %v434_v56  ;;  %v6269_v56 = vld [vmem:[#allocation8 + $0x3d8] ss:$12 sps:$4 sm:$0xff]  }
 0x189   :  { %4406 = vmatpush1.bf16.msra.mxu0 %v6125_v5  ;;  %v6196_v5 = vld [vmem:[#allocation8 + $0x514] ss:$12 sps:$4 sm:$0xff]  }
 0x18a   :  { %4449 = vmatpush1.bf16.msra.mxu1 %v6128_v6  ;;  %4407 = vmatprep.subr.bf16.mxu0 %v6133_v7 }
 0x18b   :  { %4450 = vmatprep.subr.bf16.mxu1 %v6136_v8  ;;  %v6194_v8 = vld [vmem:[#allocation8 + $0x510] ss:$12 sps:$4 sm:$0xff]  }
 0x18d   :  { %4408 = vmatpush1.bf16.msra.mxu0 %v6131_v54 }
 0x18e   :  { %4451 = vmatpush1.bf16.msra.mxu1 %v6134_v9  ;;  %4409 = vmatprep.subr.bf16.mxu0 %v6139_v10  ;;  %v6199_v9 = vld [vmem:[#allocation8 + $0x37c] ss:$12 sps:$4 sm:$0xff]  }
 0x18f   :  { %4452 = vmatprep.subr.bf16.mxu1 %v6142_v11  ;;  %v6202_v11 = vld [vmem:[#allocation8 + $0x4fc] ss:$12 sps:$4 sm:$0xff]  }
 0x191   :  { %4410 = vmatpush2.bf16.msra.mxu0 %v6137_v13  ;;  %v6771_v62 = vpop.f32.mrf.mxu1 }
 0x192   :  { %4453 = vmatpush2.bf16.msra.mxu1 %v6140_v14  ;;  %4411 = vmatprep.subr.bf16.mxu0 %v6145_v15  ;;  %v6197_v14 = vld [vmem:[#allocation8 + $0x378] ss:$12 sps:$4 sm:$0xff]  }
 0x193   :  { %4454 = vmatprep.subr.bf16.mxu1 %v6148_v17  ;;  %v2155_v6 = vpop.f32.mrf.mxu1  ;;  %v6200_v15 = vld [vmem:[#allocation8 + $0x4f8] ss:$12 sps:$4 sm:$0xff]  }
 0x194   :  { %v6205_v17 = vld [vmem:[#allocation8 + $0x364] ss:$12 sps:$4 sm:$0xff]  }
 0x195   :  { %4412 = vmatpush2.bf16.msra.mxu0 %v6143_v16  ;;  %v6780_v13 = vpop.f32.mrf.mxu1 }
 0x196   :  { %4455 = vmatpush2.bf16.msra.mxu1 %v6146_v18  ;;  %4413 = vmatprep.subr.bf16.mxu0 %v6151_v19 }
 0x197   :  { %4456 = vmatprep.subr.bf16.mxu1 %v6154_v22  ;;  %v2159_v22 = vpop.f32.mrf.mxu1 }
 0x199   :  { %4414 = vmatpush2.bf16.msra.mxu0 %v6149_v21  ;;  %v6208_v21 = vld [vmem:[#allocation8 + $0x4e4] ss:$12 sps:$4 sm:$0xff]  }
 0x19a   :  { %4457 = vmatpush2.bf16.msra.mxu1 %v6152_v26  ;;  %4415 = vmatprep.subr.bf16.mxu0 %v6157_v27  ;;  %v6203_v26 = vld [vmem:[#allocation8 + $0x360] ss:$12 sps:$4 sm:$0xff]  }
 0x19b   :  { %4458 = vmatprep.subr.bf16.mxu1 %v6160_v30  ;;  %v6211_v30 = vld [vmem:[#allocation8 + $0x34c] ss:$12 sps:$4 sm:$0xff]  }
 0x19d   :  { %4416 = vmatpush2.bf16.msra.mxu0 %v6155_v28  ;;  %v6206_v28 = vld [vmem:[#allocation8 + $0x4e0] ss:$12 sps:$4 sm:$0xff]  }
 0x19e   :  { %4459 = vmatpush2.bf16.msra.mxu1 %v6158_v31  ;;  %4417 = vmatprep.subr.bf16.mxu0 %v6163_v32 }
 0x19f   :  { %4460 = vmatprep.subr.bf16.mxu1 %v6166_v38  ;;  %v6214_v38 = vld [vmem:[#allocation8 + $0x4cc] ss:$12 sps:$4 sm:$0xff]  }
 0x1a1   :  { %4418 = vmatpush2.bf16.msra.mxu0 %v6161_v36  ;;  %v6209_v36 = vld [vmem:[#allocation8 + $0x348] ss:$12 sps:$4 sm:$0xff]  }
 0x1a2   :  { %4461 = vmatpush2.bf16.msra.mxu1 %v6164_v39  ;;  %4419 = vmatprep.subr.bf16.mxu0 %v6169_v40  ;;  %v6212_v39 = vld [vmem:[#allocation8 + $0x4c8] ss:$12 sps:$4 sm:$0xff]  }
 0x1a3   :  { %4462 = vmatprep.subr.bf16.mxu1 %v6172_v41  ;;  %v6217_v41 = vld [vmem:[#allocation8 + $0x334] ss:$12 sps:$4 sm:$0xff]  }
 0x1a5   :  { %4420 = vmatpush2.bf16.msra.mxu0 %v6167_v12  ;;  %v6215_v12 = vld [vmem:[#allocation8 + $0x330] ss:$12 sps:$4 sm:$0xff]  }
 0x1a6   :  { %4463 = vmatpush2.bf16.msra.mxu1 %v6170_v37  ;;  %4421 = vmatprep.subr.bf16.mxu0 %v6175_v45  ;;  %v6218_v37 = vld [vmem:[#allocation8 + $0x4b0] ss:$12 sps:$4 sm:$0xff]  }
 0x1a7   :  { %4464 = vmatprep.subr.bf16.mxu1 %v6178_v47  ;;  %v6223_v45 = vld [vmem:[#allocation8 + $0x31c] ss:$12 sps:$4 sm:$0xff]   ;;  %v6221_v47 = vld [vmem:[#allocation8 + $0x318] ss:$12 sps:$4 sm:$0xff]  }
 0x1a9   :  { %4422 = vmatpush2.bf16.msra.mxu0 %v6173_v49  ;;  %v6229_v49 = vld [vmem:[#allocation8 + $0x304] ss:$12 sps:$4 sm:$0xff]  }
 0x1aa   :  { %4465 = vmatpush2.bf16.msra.mxu1 %v6176_v50  ;;  %4423 = vmatprep.subr.bf16.mxu0 %v6181_v51  ;;  %v6232_v50 = vld [vmem:[#allocation8 + $0x484] ss:$12 sps:$4 sm:$0xff]   ;;  %v6227_v51 = vld [vmem:[#allocation8 + $0x300] ss:$12 sps:$4 sm:$0xff]  }
 0x1ab   :  { %4466 = vmatprep.subr.bf16.mxu1 %v6184_v53  ;;  %v6235_v53 = vld [vmem:[#allocation8 + $0x46c] ss:$12 sps:$4 sm:$0xff]  }
 0x1ad   :  { %4424 = vmatpush2.bf16.msra.mxu0 %v6179_v55  ;;  %v6238_v55 = vld [vmem:[#allocation8 + $0x5ec] ss:$12 sps:$4 sm:$0xff]  }
 0x1ae   :  { %4467 = vmatpush2.bf16.msra.mxu1 %v6182_v43  ;;  %4479 = vmatprep.subr.bf16.mxu0 %v6187_v57  ;;  %v6233_v43 = vld [vmem:[#allocation8 + $0x468] ss:$12 sps:$4 sm:$0xff]  }
 0x1af   :  { %4522 = vmatprep.subr.bf16.mxu1 %v6190_v59  ;;  %v6236_v57 = vld [vmem:[#allocation8 + $0x5e8] ss:$12 sps:$4 sm:$0xff]  }
 0x1b0   :  { %v6776_v7 = vpop.f32.mrf.mxu0  ;;  %4426 = vmatmul.mubr.bf16.vlgmr.msra.gmra.mxu0 %v6734_v0  ;;  %v6241_v59 = vld [vmem:[#allocation8 + $0x454] ss:$12 sps:$4 sm:$0xff]  }
 0x1b1   :  { %4469 = vmatmul.mubr.bf16.vlgmr.msra.gmra.mxu1 %v6773_v34  ;;  %4480 = vmatpush1.bf16.msra.mxu0 %v6185_v61  ;;  %v6244_v61 = vld [vmem:[#allocation8 + $0x5d4] ss:$12 sps:$4 sm:$0xff]  }
 0x1b2   :  { %4523 = vmatpush1.bf16.msra.mxu1 %v6188_v44  ;;  %v2112_v54 = vpop.f32.mrf.mxu0  ;;  %4481 = vmatprep.subr.bf16.mxu0 %v6193_v2  ;;  %v6239_v2 = vld [vmem:[#allocation8 + $0x450] ss:$12 sps:$4 sm:$0xff]  }
 0x1b3   :  { %v2113_v10 = vadd.f32 %v2112_v54, %v427_v3  ;;  %4524 = vmatprep.subr.bf16.mxu1 %v6196_v5  ;;  %v6242_v5 = vld [vmem:[#allocation8 + $0x5d0] ss:$12 sps:$4 sm:$0xff]  }
 0x1b4   :  { %v6782_v24 = vpop.f32.mrf.mxu0  ;;  %v6250_v54 = vld [vmem:[#allocation8 + $0x5bc] ss:$12 sps:$4 sm:$0xff]  }
 0x1b5   :  { %4482 = vmatpush1.bf16.msra.mxu0 %v6191_v4  ;;  %v2156_v18 = vadd.f32 %v2155_v6, %v2113_v10  ;;  %v6247_v6 = vld [vmem:[#allocation8 + $0x43c] ss:$12 sps:$4 sm:$0xff]  }
 0x1b6   :  { %4525 = vmatpush1.bf16.msra.mxu1 %v6194_v8  ;;  %v2116_v16 = vpop.f32.mrf.mxu0  ;;  %4483 = vmatprep.subr.bf16.mxu0 %v6199_v9 }
 0x1b7   :  { %v2117_v19 = vadd.f32 %v2116_v16, %v427_v3  ;;  %4526 = vmatprep.subr.bf16.mxu1 %v6202_v11  ;;  %v2425_v31 = vmax.f32 %v2156_v18, 0.0  ;;  %v6245_v11 = vld [vmem:[#allocation8 + $0x438] ss:$12 sps:$4 sm:$0xff]  }
 0x1b8   :  { %v6253_v16 = vld [vmem:[#allocation8 + $0x424] ss:$12 sps:$4 sm:$0xff]  }
 0x1b9   :  { %v2160_v27 = vadd.f32 %v2159_v22, %v2117_v19  ;;  %4484 = vmatpush1.bf16.msra.mxu0 %v6197_v14  ;;  %v6248_v14 = vld [vmem:[#allocation8 + $0x5b8] ss:$12 sps:$4 sm:$0xff]   ;;  %v430_v22 = vsub.s32 6, %v6723_v20 }
 0x1ba   :  { %4527 = vmatpush1.bf16.msra.mxu1 %v6200_v15  ;;  %4485 = vmatprep.subr.bf16.mxu0 %v6205_v17  ;;  %v6256_v19 = vld [vmem:[#allocation8 + $0x5a4] ss:$12 sps:$4 sm:$0xff]  }
 0x1bb   :  { %v2437_v32 = vmax.f32 %v2160_v27, 0.0  ;;  %4528 = vmatprep.subr.bf16.mxu1 %v6208_v21  ;;  %v422_v21 = vsub.s32 4, %v6723_v20 }
 0x1bd   :  { %4486 = vmatpush1.bf16.msra.mxu0 %v6203_v26  ;;  %v6784_v40 = vpack.c.bf16 %v2437_v32, %v2425_v31  ;;  %v6259_v31 = vld [vmem:[#allocation8 + $0x40c] ss:$12 sps:$4 sm:$0xff]  }
 0x1be   :  { %4529 = vmatpush1.bf16.msra.mxu1 %v6206_v28  ;;  %4487 = vmatprep.subr.bf16.mxu0 %v6211_v30  ;;  %v6251_v28 = vld [vmem:[#allocation8 + $0x420] ss:$12 sps:$4 sm:$0xff]  }
 0x1bf   :  { %4511 = vmatprep.mubr.bf16.mxu0 %v6784_v40  ;;  %4530 = vmatprep.subr.bf16.mxu1 %v6214_v38  ;;  %v6254_v30 = vld [vmem:[#allocation8 + $0x5a0] ss:$12 sps:$4 sm:$0xff]   ;;  %v6257_v38 = vld [vmem:[#allocation8 + $0x408] ss:$12 sps:$4 sm:$0xff]  }
 0x1c1   :  { %4488 = vmatpush1.bf16.msra.mxu0 %v6209_v36 }
 0x1c2   :  { %4531 = vmatpush1.bf16.msra.mxu1 %v6212_v39  ;;  %4489 = vmatprep.subr.bf16.mxu0 %v6217_v41  ;;  %v6262_v39 = vld [vmem:[#allocation8 + $0x58c] ss:$12 sps:$4 sm:$0xff]   ;;  %v6260_v41 = vld [vmem:[#allocation8 + $0x588] ss:$12 sps:$4 sm:$0xff]  }
 0x1c3   :  { %4532 = vmatprep.subr.bf16.mxu1 %v6220_v42 }
 0x1c5   :  { %4490 = vmatpush1.bf16.msra.mxu0 %v6215_v12  ;;  %v6265_v12 = vld [vmem:[#allocation8 + $0x3f4] ss:$12 sps:$4 sm:$0xff]  }
 0x1c6   :  { %4533 = vmatpush1.bf16.msra.mxu1 %v6218_v37  ;;  %4491 = vmatprep.subr.bf16.mxu0 %v6223_v45  ;;  %v6268_v37 = vld [vmem:[#allocation8 + $0x574] ss:$12 sps:$4 sm:$0xff]   ;;  %v423_v45 = vrot.slane %v6473_v60, %v422_v21  ;;  %v6313_v21 = vld [vmem:[#allocation8 + $0x7e4] ss:$12 sps:$4 sm:$0xff]  }
 0x1c7   :  { %4534 = vmatprep.subr.bf16.mxu1 %v6226_v46  ;;  %v431_v46 = vrot.slane %v6473_v60, %v430_v22  ;;  %v6280_v60 = vld [vmem:[#allocation8 + $0x544] ss:$12 sps:$4 sm:$0xff]   ;;  %v6290_v22 = vld [vmem:[#allocation8 + $0x660] ss:$12 sps:$4 sm:$0xff]  }
 0x1c9   :  { %4492 = vmatpush1.bf16.msra.mxu0 %v6221_v47  ;;  %v6263_v47 = vld [vmem:[#allocation8 + $0x3f0] ss:$12 sps:$4 sm:$0xff]  }
 0x1ca   :  { %4535 = vmatpush1.bf16.msra.mxu1 %v6224_v48  ;;  %4493 = vmatprep.subr.bf16.mxu0 %v6229_v49  ;;  %v2115_v48 = vadd.f32 %v6782_v24, %v423_v45  ;;  %v6266_v49 = vld [vmem:[#allocation8 + $0x570] ss:$12 sps:$4 sm:$0xff]  }
 0x1cb   :  { %4536 = vmatprep.subr.bf16.mxu1 %v6232_v50  ;;  %v6271_v50 = vld [vmem:[#allocation8 + $0x3dc] ss:$12 sps:$4 sm:$0xff]  }
 0x1cd   :  { %4494 = vmatpush1.bf16.msra.mxu0 %v6227_v51 }
 0x1ce   :  { %4537 = vmatpush1.bf16.msra.mxu1 %v6230_v52  ;;  %4495 = vmatprep.subr.bf16.mxu0 %v6235_v53  ;;  %v6274_v52 = vld [vmem:[#allocation8 + $0x55c] ss:$12 sps:$4 sm:$0xff]   ;;  %v2111_v53 = vadd.f32 %v6776_v7, %v423_v45  ;;  %v6316_v45 = vld [vmem:[#allocation8 + $0x604] ss:$12 sps:$4 sm:$0xff]  }
 0x1cf   :  { %4538 = vmatprep.subr.bf16.mxu1 %v6238_v55 }
 0x1d0   :  { %v6790_v1 = vpop.f32.mrf.mxu0 }
 0x1d1   :  { %v6788_v44 = vpop.f32.mrf.mxu1  ;;  %4496 = vmatpush2.bf16.msra.mxu0 %v6233_v43  ;;  %v2158_v43 = vadd.f32 %v6780_v13, %v2115_v48  ;;  %v6295_v13 = vld [vmem:[#allocation8 + $0x82c] ss:$12 sps:$4 sm:$0xff]  }
 0x1d2   :  { %4539 = vmatpush2.bf16.msra.mxu1 %v6236_v57  ;;  %v2241_v4 = vpop.f32.mrf.mxu0  ;;  %4497 = vmatprep.subr.bf16.mxu0 %v6241_v59  ;;  %v2197_v55 = vadd.f32 %v6788_v44, %v431_v46  ;;  %v6272_v57 = vld [vmem:[#allocation8 + $0x558] ss:$12 sps:$4 sm:$0xff]   ;;  %v6278_v44 = vld [vmem:[#allocation8 + $0x540] ss:$12 sps:$4 sm:$0xff]  }
 0x1d3   :  { %v2198_v3 = vpop.f32.mrf.mxu1  ;;  %4540 = vmatprep.subr.bf16.mxu1 %v6244_v61  ;;  %v6277_v59 = vld [vmem:[#allocation8 + $0x3c4] ss:$12 sps:$4 sm:$0xff]   ;;  %v2436_v7 = vmax.f32 %v2158_v43, 0.0  ;;  %v6314_v48 = vld [vmem:[#allocation8 + $0x600] ss:$12 sps:$4 sm:$0xff]  }
 0x1d4   :  { %v2199_v8 = vadd.f32 %v2198_v3, %v435_v33  ;;  %v2243_v10 = vpop.f32.mrf.mxu0  ;;  %v2240_v61 = vadd.f32 %v6790_v1, %v2197_v55  ;;  %v6283_v3 = vld [vmem:[#allocation8 + $0x6ac] ss:$12 sps:$4 sm:$0xff]   ;;  %v6293_v1 = vld [vmem:[#allocation8 + $0x828] ss:$12 sps:$4 sm:$0xff]   ;;  %v6811_v55 = vld [vmem:[#allocation7 + $0x8] sm:$0xf] }
 0x1d5   :  { %v2200_v9 = vpop.f32.mrf.mxu1  ;;  %4498 = vmatpush2.bf16.msra.mxu0 %v6239_v2  ;;  %v6275_v2 = vld [vmem:[#allocation8 + $0x3c0] ss:$12 sps:$4 sm:$0xff]   ;;  %v6341_v43 = vld [vmem:[#allocation8 + $0x8e8] ss:$12 sps:$4 sm:$0xff]  }
 0x1d6   :  { %4541 = vmatpush2.bf16.msra.mxu1 %v6242_v5  ;;  %4499 = vmatprep.subr.bf16.mxu0 %v6247_v6  ;;  %v2242_v17 = vadd.f32 %v2241_v4, %v2199_v8  ;;  %v2245_v26 = vpop.f32.mrf.mxu0  ;;  %v2201_v51 = vadd.f32 %v2200_v9, %v431_v46  ;;  %v2426_v6 = vmax.f32 %v2240_v61, 0.0  ;;  %v6281_v8 = vld [vmem:[#allocation8 + $0x6a8] ss:$12 sps:$4 sm:$0xff]   ;;  %v6329_v46 = vld [vmem:[#allocation8 + $0x798] ss:$12 sps:$4 sm:$0xff]  }
 0x1d7   :  { %v2202_v15 = vpop.f32.mrf.mxu1  ;;  %4542 = vmatprep.subr.bf16.mxu1 %v6250_v54 }
 0x1d8   :  { %v2203_v18 = vadd.f32 %v2202_v15, %v435_v33  ;;  %v2427_v32 = vmax.f32 %v2242_v17, 0.0  ;;  %v2244_v24 = vadd.f32 %v2243_v10, %v2201_v51  ;;  %v2154_v33 = vadd.f32 %v6771_v62, %v2111_v53  ;;  %v6286_v62 = vld [vmem:[#allocation8 + $0x694] ss:$12 sps:$4 sm:$0xff]   ;;  %v6299_v15 = vld [vmem:[#allocation8 + $0x810] ss:$12 sps:$4 sm:$0xff]  }
 0x1d9   :  { %4500 = vmatpush2.bf16.msra.mxu0 %v6245_v11  ;;  %v6301_v10 = vld [vmem:[#allocation8 + $0x814] ss:$12 sps:$4 sm:$0xff]   ;;  %v6284_v11 = vld [vmem:[#allocation8 + $0x690] ss:$12 sps:$4 sm:$0xff]   ;;  %v6287_v17 = vld [vmem:[#allocation8 + $0x678] ss:$12 sps:$4 sm:$0xff]  }
 0x1da   :  { %v2246_v27 = vadd.f32 %v2245_v26, %v2203_v18  ;;  %4543 = vmatpush2.bf16.msra.mxu1 %v6248_v14  ;;  %4501 = vmatprep.subr.bf16.mxu0 %v6253_v16  ;;  %v2438_v4 = vmax.f32 %v2244_v24, 0.0  ;;  %v2424_v5 = vmax.f32 %v2154_v33, 0.0  ;;  %v6289_v14 = vld [vmem:[#allocation8 + $0x67c] ss:$12 sps:$4 sm:$0xff]   ;;  %v6292_v18 = vld [vmem:[#allocation8 + $0x664] ss:$12 sps:$4 sm:$0xff]  }
 0x1db   :  { %4544 = vmatprep.subr.bf16.mxu1 %v6256_v19  ;;  %v6307_v16 = vld [vmem:[#allocation8 + $0x7fc] ss:$12 sps:$4 sm:$0xff]   ;;  %v6305_v19 = vld [vmem:[#allocation8 + $0x7f8] ss:$12 sps:$4 sm:$0xff]  }
 0x1dc   :  { %v2439_v36 = vmax.f32 %v2246_v27, 0.0  ;;  %v6803_v54 = vpack.c.bf16 %v2436_v7, %v2424_v5  ;;  %v6805_v9 = vpack.c.bf16 %v2438_v4, %v2426_v6  ;;  %v6298_v26 = vld [vmem:[#allocation8 + $0x64c] ss:$12 sps:$4 sm:$0xff]   ;;  %v6320_v53 = vld [vmem:[#allocation8 + $0x768] ss:$12 sps:$4 sm:$0xff]  }
 0x1dd   :  { %4502 = vmatpush2.bf16.msra.mxu0 %v6251_v28  ;;  %v6311_v27 = vld [vmem:[#allocation8 + $0x7e0] ss:$12 sps:$4 sm:$0xff]   ;;  %v6326_v33 = vld [vmem:[#allocation8 + $0x750] ss:$12 sps:$4 sm:$0xff]   ;;  %v6332_v5 = vld [vmem:[#allocation8 + $0x738] ss:$12 sps:$4 sm:$0xff]  }
 0x1de   :  { %v6794_v42 = vpack.c.bf16 %v2439_v36, %v2427_v32  ;;  %4545 = vmatpush2.bf16.msra.mxu1 %v6254_v30  ;;  %4503 = vmatprep.subr.bf16.mxu0 %v6259_v31  ;;  %v6319_v28 = vld [vmem:[#allocation8 + $0x7cc] ss:$12 sps:$4 sm:$0xff]   ;;  %v6296_v30 = vld [vmem:[#allocation8 + $0x648] ss:$12 sps:$4 sm:$0xff]   ;;  %v6347_v7 = vld [vmem:[#allocation8 + $0x8d0] ss:$12 sps:$4 sm:$0xff]  }
 0x1df   :  { %4546 = vmatprep.subr.bf16.mxu1 %v6262_v39  ;;  %v6304_v31 = vld [vmem:[#allocation8 + $0x634] ss:$12 sps:$4 sm:$0xff]   ;;  %v6310_v39 = vld [vmem:[#allocation8 + $0x61c] ss:$12 sps:$4 sm:$0xff]   ;;  %v6343_v51 = vld [vmem:[#allocation8 + $0x8ec] ss:$12 sps:$4 sm:$0xff]  }
 0x1e0   :  { %4554 = vmatprep.mubr.bf16.mxu1 %v6794_v42  ;;  %v6317_v32 = vld [vmem:[#allocation8 + $0x7c8] ss:$12 sps:$4 sm:$0xff]  }
 0x1e1   :  { %4504 = vmatpush2.bf16.msra.mxu0 %v6257_v38  ;;  %v6325_v36 = vld [vmem:[#allocation8 + $0x7b4] ss:$12 sps:$4 sm:$0xff]   ;;  %v6302_v38 = vld [vmem:[#allocation8 + $0x630] ss:$12 sps:$4 sm:$0xff]  }
 0x1e2   :  { %4547 = vmatpush2.bf16.msra.mxu1 %v6260_v41  ;;  %4505 = vmatprep.subr.bf16.mxu0 %v6265_v12  ;;  %v6323_v41 = vld [vmem:[#allocation8 + $0x7b0] ss:$12 sps:$4 sm:$0xff]  }
 0x1e3   :  { %4548 = vmatprep.subr.bf16.mxu1 %v6268_v37  ;;  %v6331_v12 = vld [vmem:[#allocation8 + $0x79c] ss:$12 sps:$4 sm:$0xff]   ;;  %v6308_v37 = vld [vmem:[#allocation8 + $0x618] ss:$12 sps:$4 sm:$0xff]  }
 0x1e5   :  { %4506 = vmatpush2.bf16.msra.mxu0 %v6263_v47  ;;  %v6337_v47 = vld [vmem:[#allocation8 + $0x784] ss:$12 sps:$4 sm:$0xff]  }
 0x1e6   :  { %4549 = vmatpush2.bf16.msra.mxu1 %v6266_v49  ;;  %4507 = vmatprep.subr.bf16.mxu0 %v6271_v50  ;;  %v6322_v49 = vld [vmem:[#allocation8 + $0x76c] ss:$12 sps:$4 sm:$0xff]  }
 0x1e7   :  { %4550 = vmatprep.subr.bf16.mxu1 %v6274_v52  ;;  %v6335_v50 = vld [vmem:[#allocation8 + $0x780] ss:$12 sps:$4 sm:$0xff]  }
 0x1e9   :  { %4508 = vmatpush2.bf16.msra.mxu0 %v6269_v56  ;;  %v6328_v56 = vld [vmem:[#allocation8 + $0x754] ss:$12 sps:$4 sm:$0xff]  }
 0x1ea   :  { %4551 = vmatpush2.bf16.msra.mxu1 %v6272_v57  ;;  %4509 = vmatprep.subr.bf16.mxu0 %v6277_v59  ;;  %v443_v57 = vrot.slane %v6811_v55, %v6737_v63  ;;  %v6349_v59 = vld [vmem:[#allocation8 + $0x8d4] ss:$12 sps:$4 sm:$0xff]  }
 0x1eb   :  { %4552 = vmatprep.subr.bf16.mxu1 %v6280_v60 }
 0x1ed   :  { %4510 = vmatpush2.bf16.msra.mxu0 %v6275_v2  ;;  %v6334_v2 = vld [vmem:[#allocation8 + $0x73c] ss:$12 sps:$4 sm:$0xff]  }
 0x1ee   :  { %4553 = vmatpush2.bf16.msra.mxu1 %v6278_v44  ;;  %4565 = vmatprep.subr.bf16.mxu0 %v6283_v3  ;;  %v6355_v3 = vld [vmem:[#allocation8 + $0x8bc] ss:$12 sps:$4 sm:$0xff]  }
 0x1ef   :  { %4608 = vmatprep.subr.bf16.mxu1 %v6295_v13 }
 0x1f0   :  { %4512 = vmatmul.mubr.bf16.vlgmr.msra.gmra.mxu0 %v6803_v54 }
 0x1f1   :  { %4555 = vmatmul.mubr.bf16.vlgmr.msra.gmra.mxu1 %v6805_v9  ;;  %4566 = vmatpush1.bf16.msra.mxu0 %v6281_v8  ;;  %v6809_v52 = vpop.f32.mrf.mxu1  ;;  %v6340_v8 = vld [vmem:[#allocation8 + $0x724] ss:$12 sps:$4 sm:$0xff]  }
 0x1f2   :  { %4567 = vmatprep.subr.bf16.mxu0 %v6286_v62  ;;  %4609 = vmatpush1.bf16.msra.mxu1 %v6293_v1  ;;  %v6353_v62 = vld [vmem:[#allocation8 + $0x8b8] ss:$12 sps:$4 sm:$0xff]  }
 0x1f3   :  { %4610 = vmatprep.subr.bf16.mxu1 %v6301_v10  ;;  %v2327_v24 = vpop.f32.mrf.mxu1 }
 0x1f5   :  { %4568 = vmatpush1.bf16.msra.mxu0 %v6284_v11  ;;  %v2329_v4 = vpop.f32.mrf.mxu1  ;;  %v6361_v11 = vld [vmem:[#allocation8 + $0x8a4] ss:$12 sps:$4 sm:$0xff]  }
 0x1f6   :  { %4569 = vmatprep.subr.bf16.mxu0 %v6289_v14  ;;  %4611 = vmatpush1.bf16.msra.mxu1 %v6299_v15 }
 0x1f7   :  { %4612 = vmatprep.subr.bf16.mxu1 %v6307_v16  ;;  %v2331_v14 = vpop.f32.mrf.mxu1  ;;  %v6338_v16 = vld [vmem:[#allocation8 + $0x720] ss:$12 sps:$4 sm:$0xff]  }
 0x1f9   :  { %4570 = vmatpush1.bf16.msra.mxu0 %v6287_v17  ;;  %v6346_v17 = vld [vmem:[#allocation8 + $0x70c] ss:$12 sps:$4 sm:$0xff]  }
 0x1fa   :  { %4571 = vmatprep.subr.bf16.mxu0 %v6292_v18  ;;  %4613 = vmatpush1.bf16.msra.mxu1 %v6305_v19  ;;  %v6359_v18 = vld [vmem:[#allocation8 + $0x8a0] ss:$12 sps:$4 sm:$0xff]  }
 0x1fb   :  { %4614 = vmatprep.subr.bf16.mxu1 %v6313_v21 }
 0x1fd   :  { %4572 = vmatpush1.bf16.msra.mxu0 %v6290_v22  ;;  %v6367_v22 = vld [vmem:[#allocation8 + $0x88c] ss:$12 sps:$4 sm:$0xff]  }
 0x1fe   :  { %4573 = vmatprep.subr.bf16.mxu0 %v6298_v26  ;;  %4615 = vmatpush1.bf16.msra.mxu1 %v6311_v27  ;;  %v6344_v27 = vld [vmem:[#allocation8 + $0x708] ss:$12 sps:$4 sm:$0xff]  }
 0x1ff   :  { %4616 = vmatprep.subr.bf16.mxu1 %v6319_v28  ;;  %v6352_v28 = vld [vmem:[#allocation8 + $0x6f4] ss:$12 sps:$4 sm:$0xff]  }
 0x201   :  { %4574 = vmatpush1.bf16.msra.mxu0 %v6296_v30  ;;  %v6365_v30 = vld [vmem:[#allocation8 + $0x888] ss:$12 sps:$4 sm:$0xff]  }
 0x202   :  { %4575 = vmatprep.subr.bf16.mxu0 %v6304_v31  ;;  %4617 = vmatpush1.bf16.msra.mxu1 %v6317_v32  ;;  %v6372_v31 = vld [vmem:[#allocation8 + $0x874] ss:$12 sps:$4 sm:$0xff]   ;;  %v439_v32 = vrot.slane %v6811_v55, %v6728_v25 }
 0x203   :  { %4618 = vmatprep.subr.bf16.mxu1 %v6325_v36  ;;  %v6350_v36 = vld [vmem:[#allocation8 + $0x6f0] ss:$12 sps:$4 sm:$0xff]  }
 0x205   :  { %4576 = vmatpush1.bf16.msra.mxu0 %v6302_v38 }
 0x206   :  { %4577 = vmatprep.subr.bf16.mxu0 %v6310_v39  ;;  %4619 = vmatpush1.bf16.msra.mxu1 %v6323_v41  ;;  %v6358_v39 = vld [vmem:[#allocation8 + $0x6dc] ss:$12 sps:$4 sm:$0xff]  }
 0x207   :  { %4620 = vmatprep.subr.bf16.mxu1 %v6331_v12  ;;  %v6370_v41 = vld [vmem:[#allocation8 + $0x870] ss:$12 sps:$4 sm:$0xff]  }
 0x208   :  { %v6377_v12 = vld [vmem:[#allocation8 + $0x85c] ss:$12 sps:$4 sm:$0xff]  }
 0x209   :  { %4578 = vmatpush1.bf16.msra.mxu0 %v6308_v37 }
 0x20a   :  { %4579 = vmatprep.subr.bf16.mxu0 %v6316_v45  ;;  %4621 = vmatpush1.bf16.msra.mxu1 %v6329_v46  ;;  %v6356_v45 = vld [vmem:[#allocation8 + $0x6d8] ss:$12 sps:$4 sm:$0xff]  }
 0x20b   :  { %4622 = vmatprep.subr.bf16.mxu1 %v6337_v47  ;;  %v6364_v47 = vld [vmem:[#allocation8 + $0x6c4] ss:$12 sps:$4 sm:$0xff]  }
 0x20d   :  { %4580 = vmatpush1.bf16.msra.mxu0 %v6314_v48  ;;  %v6375_v48 = vld [vmem:[#allocation8 + $0x858] ss:$12 sps:$4 sm:$0xff]  }
 0x20e   :  { %4581 = vmatprep.subr.bf16.mxu0 %v6322_v49  ;;  %4623 = vmatpush1.bf16.msra.mxu1 %v6335_v50  ;;  %v6382_v49 = vld [vmem:[#allocation8 + $0x844] ss:$12 sps:$4 sm:$0xff]  }
 0x20f   :  { %4624 = vmatprep.subr.bf16.mxu1 %v6343_v51  ;;  %v6362_v51 = vld [vmem:[#allocation8 + $0x6c0] ss:$12 sps:$4 sm:$0xff]  }
 0x210   :  { %v2282_v60 = vpop.f32.mrf.mxu0 }
 0x211   :  { %4582 = vmatpush2.bf16.msra.mxu0 %v6320_v53  ;;  %v2283_v37 = vadd.f32 %v2282_v60, %v439_v32 }
 0x212   :  { %v2284_v61 = vpop.f32.mrf.mxu0  ;;  %4583 = vmatprep.subr.bf16.mxu0 %v6328_v56  ;;  %4625 = vmatpush2.bf16.msra.mxu1 %v6341_v43  ;;  %v6368_v56 = vld [vmem:[#allocation8 + $0x170] ss:$12 sps:$4 sm:$0xff]   ;;  %v6380_v43 = vld [vmem:[#allocation8 + $0x840] ss:$12 sps:$4 sm:$0xff]  }
 0x213   :  { %v2285_v44 = vadd.f32 %v2284_v61, %v443_v57  ;;  %4626 = vmatprep.subr.bf16.mxu1 %v6349_v59  ;;  %v2326_v50 = vadd.f32 %v6809_v52, %v2283_v37  ;;  %v451_v52 = vrot.slane %v6811_v55, %v418_v23  ;;  %v447_v61 = vrot.slane %v6811_v55, %v6762_v35  ;;  %v6394_v37 = vld [vmem:[#allocation8 + $0xe0] ss:$12 sps:$4 sm:$0xff]  }
 0x214   :  { %v2286_v13 = vpop.f32.mrf.mxu0 }
 0x215   :  { %4584 = vmatpush2.bf16.msra.mxu0 %v6326_v33  ;;  %v2328_v1 = vadd.f32 %v2327_v24, %v2285_v44  ;;  %v2287_v38 = vadd.f32 %v2286_v13, %v439_v32  ;;  %v2428_v59 = vmax.f32 %v2326_v50, 0.0  ;;  %v6369_v24 = vld [vmem:[#allocation8 + $0xb0] ss:$12 sps:$4 sm:$0xff]   ;;  %v6373_v33 = vld [vmem:[#allocation8 + $0x158] ss:$12 sps:$4 sm:$0xff]  }
 0x216   :  { %v2288_v6 = vpop.f32.mrf.mxu0  ;;  %4585 = vmatprep.subr.bf16.mxu0 %v6334_v2  ;;  %4627 = vmatpush2.bf16.msra.mxu1 %v6347_v7  ;;  %v6374_v44 = vld [vmem:[#allocation8 + $0x98] ss:$12 sps:$4 sm:$0xff]   ;;  %v6378_v13 = vld [vmem:[#allocation8 + $0x140] ss:$12 sps:$4 sm:$0xff]   ;;  %v6400_v50 = vld [vmem:[#allocation8 + $0x8] ss:$12 sps:$4 sm:$0xff]  }
 0x217   :  { %v2289_v10 = vadd.f32 %v2288_v6, %v443_v57  ;;  %4628 = vmatprep.subr.bf16.mxu1 %v6355_v3  ;;  %v2429_v19 = vmax.f32 %v2328_v1, 0.0  ;;  %v2330_v46 = vadd.f32 %v2329_v4, %v2287_v38  ;;  %v6385_v57 = vld [vmem:[#allocation8 + $0x2f0] ss:$12 sps:$4 sm:$0xff]   ;;  %v6383_v1 = vld [vmem:[#allocation8 + $0x128] ss:$12 sps:$4 sm:$0xff]  }
 0x218   :  { %v6390_v38 = vld [vmem:[#allocation8 + $0xf8] ss:$12 sps:$4 sm:$0xff]  }
 0x219   :  { %v2332_v15 = vadd.f32 %v2331_v14, %v2289_v10  ;;  %4586 = vmatpush2.bf16.msra.mxu0 %v6332_v5  ;;  %v2440_v53 = vmax.f32 %v2330_v46, 0.0  ;;  %v6396_v46 = vld [vmem:[#allocation8 + $0x20] ss:$12 sps:$4 sm:$0xff]  }
 0x21a   :  { %4587 = vmatprep.subr.bf16.mxu0 %v6340_v8  ;;  %4629 = vmatpush2.bf16.msra.mxu1 %v6353_v62  ;;  %v6379_v62 = vld [vmem:[#allocation8 + $0x80] ss:$12 sps:$4 sm:$0xff]  }
 0x21b   :  { %v2441_v21 = vmax.f32 %v2332_v15, 0.0  ;;  %4630 = vmatprep.subr.bf16.mxu1 %v6361_v11  ;;  %v6821_v60 = vpack.c.bf16 %v2440_v53, %v2428_v59  ;;  %v6402_v53 = vld [vmem:[#allocation8 + $0x1d0] ss:$12 sps:$4 sm:$0xff]   ;;  %v6406_v59 = vld [vmem:[#allocation8 + $0x1b8] ss:$12 sps:$4 sm:$0xff]  }
 0x21d   :  { %4588 = vmatpush2.bf16.msra.mxu0 %v6338_v16  ;;  %v6815_v26 = vpack.c.bf16 %v2441_v21, %v2429_v19  ;;  %v6386_v19 = vld [vmem:[#allocation8 + $0x110] ss:$12 sps:$4 sm:$0xff]  }
 0x21e   :  { %4589 = vmatprep.subr.bf16.mxu0 %v6346_v17  ;;  %4631 = vmatpush2.bf16.msra.mxu1 %v6359_v18  ;;  %v6384_v17 = vld [vmem:[#allocation8 + $0x68] ss:$12 sps:$4 sm:$0xff]  }
 0x21f   :  { %4597 = vmatprep.mubr.bf16.mxu0 %v6815_v26  ;;  %4632 = vmatprep.subr.bf16.mxu1 %v6367_v22 }
 0x221   :  { %4590 = vmatpush2.bf16.msra.mxu0 %v6344_v27 }
 0x222   :  { %4591 = vmatprep.subr.bf16.mxu0 %v6352_v28  ;;  %4633 = vmatpush2.bf16.msra.mxu1 %v6365_v30  ;;  %v6387_v30 = vld [vmem:[#allocation8 + $0x230] ss:$12 sps:$4 sm:$0xff]  }
 0x223   :  { %4634 = vmatprep.subr.bf16.mxu1 %v6372_v31  ;;  %v6388_v31 = vld [vmem:[#allocation8 + $0x50] ss:$12 sps:$4 sm:$0xff]  }
 0x225   :  { %4592 = vmatpush2.bf16.msra.mxu0 %v6350_v36  ;;  %v6389_v36 = vld [vmem:[#allocation8 + $0x2d8] ss:$12 sps:$4 sm:$0xff]  }
 0x226   :  { %4593 = vmatprep.subr.bf16.mxu0 %v6358_v39  ;;  %4635 = vmatpush2.bf16.msra.mxu1 %v6370_v41  ;;  %v6391_v39 = vld [vmem:[#allocation8 + $0x218] ss:$12 sps:$4 sm:$0xff]  }
 0x227   :  { %4636 = vmatprep.subr.bf16.mxu1 %v6377_v12  ;;  %v6392_v41 = vld [vmem:[#allocation8 + $0x38] ss:$12 sps:$4 sm:$0xff]   ;;  %v6393_v12 = vld [vmem:[#allocation8 + $0x2c0] ss:$12 sps:$4 sm:$0xff]  }
 0x229   :  { %4594 = vmatpush2.bf16.msra.mxu0 %v6356_v45  ;;  %v6395_v45 = vld [vmem:[#allocation8 + $0x200] ss:$12 sps:$4 sm:$0xff]  }
 0x22a   :  { %4595 = vmatprep.subr.bf16.mxu0 %v6364_v47  ;;  %4637 = vmatpush2.bf16.msra.mxu1 %v6375_v48  ;;  %v6397_v47 = vld [vmem:[#allocation8 + $0x2a8] ss:$12 sps:$4 sm:$0xff]  }
 0x22b   :  { %4638 = vmatprep.subr.bf16.mxu1 %v6382_v49  ;;  %v6398_v48 = vld [vmem:[#allocation8 + $0xc8] ss:$12 sps:$4 sm:$0xff]  }
 0x22c   :  { %v6399_v49 = vld [vmem:[#allocation8 + $0x1e8] ss:$12 sps:$4 sm:$0xff]  }
 0x22d   :  { %4596 = vmatpush2.bf16.msra.mxu0 %v6362_v51  ;;  %v6401_v51 = vld [vmem:[#allocation8 + $0x290] ss:$12 sps:$4 sm:$0xff]  }
 0x22e   :  { %5511 = vmatprep.subr.bf16.mxu0 %v6368_v56  ;;  %4639 = vmatpush2.bf16.msra.mxu1 %v6380_v43  ;;  %v6404_v56 = vld [vmem:[#allocation8 + $0x3b0] ss:$12 sps:$4 sm:$0xff]   ;;  %v6405_v43 = vld [vmem:[#allocation8 + $0x278] ss:$12 sps:$4 sm:$0xff]  }
 0x22f   :  { %5533 = vmatprep.subr.bf16.mxu1 %v6385_v57  ;;  %v6407_v57 = vld [vmem:[#allocation8 + $0x458] ss:$12 sps:$4 sm:$0xff]  }
 0x230   :  { %v2411_v7 = vpop.f32.mrf.mxu0  ;;  %4598 = vmatmul.mubr.bf16.vlgmr.msra.gmra.mxu0 %v6821_v60 }
 0x231   :  { %v2368_v2 = vpop.f32.mrf.mxu1  ;;  %5512 = vmatpush3.bf16.msra.mxu0 %v6369_v24  ;;  %4683 = vmatprep.mubr.bf16.mxu0 %v6742_v29  ;;  %v6408_v24 = vld [vmem:[#allocation8 + $0x398] ss:$12 sps:$4 sm:$0xff]  }
 0x232   :  { %v2413_v4 = vpop.f32.mrf.mxu0  ;;  %5513 = vmatprep.subr.bf16.mxu0 %v6373_v33  ;;  %v2369_v20 = vadd.f32 %v2368_v2, %v447_v61  ;;  %v6409_v33 = vld [vmem:[#allocation8 + $0x260] ss:$12 sps:$4 sm:$0xff]  }
 0x233   :  { %v2370_v3 = vpop.f32.mrf.mxu1  ;;  %v6412_v2 = vld [vmem:[#allocation8 + $0x380] ss:$12 sps:$4 sm:$0xff]  }
 0x234   :  { %v2371_v5 = vadd.f32 %v2370_v3, %v451_v52  ;;  %v2415_v23 = vpop.f32.mrf.mxu0  ;;  %v2412_v15 = vadd.f32 %v2411_v7, %v2369_v20  ;;  %v6413_v7 = vld [vmem:[#allocation8 + $0x248] ss:$12 sps:$4 sm:$0xff]   ;;  %v6421_v20 = vld [vmem:[#allocation8 + $0x5d8] ss:$12 sps:$4 sm:$0xff]  }
 0x235   :  { %v2372_v6 = vpop.f32.mrf.mxu1  ;;  %5514 = vmatpush3.bf16.msra.mxu0 %v6374_v44  ;;  %v6415_v44 = vld [vmem:[#allocation8 + $0x428] ss:$12 sps:$4 sm:$0xff]  }
 0x236   :  { %v2373_v8 = vadd.f32 %v2372_v6, %v447_v61  ;;  %5515 = vmatprep.subr.bf16.mxu0 %v6378_v13  ;;  %v2414_v10 = vadd.f32 %v2413_v4, %v2371_v5  ;;  %v2417_v29 = vpop.f32.mrf.mxu0  ;;  %v2430_v27 = vmax.f32 %v2412_v15, 0.0  ;;  %v6410_v61 = vld [vmem:[#allocation8 + $0x1a0] ss:$12 sps:$4 sm:$0xff]   ;;  %v6416_v3 = vld [vmem:[#allocation8 + $0x368] ss:$12 sps:$4 sm:$0xff]  }
 0x237   :  { %v2374_v55 = vpop.f32.mrf.mxu1  ;;  %v6417_v4 = vld [vmem:[#allocation8 + $0x5f0] ss:$12 sps:$4 sm:$0xff]   ;;  %v6422_v6 = vld [vmem:[#allocation8 + $0x3f8] ss:$12 sps:$4 sm:$0xff]  }
 0x238   :  { %v2416_v11 = vadd.f32 %v2415_v23, %v2373_v8  ;;  %v2375_v14 = vadd.f32 %v2374_v55, %v451_v52  ;;  %v2431_v21 = vmax.f32 %v2414_v10, 0.0  ;;  %v6411_v52 = vld [vmem:[#allocation8 + $0x440] ss:$12 sps:$4 sm:$0xff]   ;;  %v6419_v13 = vld [vmem:[#allocation8 + $0x530] ss:$12 sps:$4 sm:$0xff]  }
 0x239   :  { %5516 = vmatpush3.bf16.msra.mxu0 %v6379_v62  ;;  %v6420_v5 = vld [vmem:[#allocation8 + $0x350] ss:$12 sps:$4 sm:$0xff]   ;;  %v6423_v23 = vld [vmem:[#allocation8 + $0x518] ss:$12 sps:$4 sm:$0xff]   ;;  %v6425_v62 = vld [vmem:[#allocation8 + $0x5c0] ss:$12 sps:$4 sm:$0xff]  }
 0x23a   :  { %v2418_v16 = vadd.f32 %v2417_v29, %v2375_v14  ;;  %v2442_v18 = vmax.f32 %v2416_v11, 0.0  ;;  %5517 = vmatprep.subr.bf16.mxu0 %v6383_v1  ;;  %v6424_v8 = vld [vmem:[#allocation8 + $0x338] ss:$12 sps:$4 sm:$0xff]   ;;  %v6426_v55 = vld [vmem:[#allocation8 + $0x3e0] ss:$12 sps:$4 sm:$0xff]  }
 0x23b   :  { %v6427_v1 = vld [vmem:[#allocation8 + $0x500] ss:$12 sps:$4 sm:$0xff]   ;;  %v6429_v11 = vld [vmem:[#allocation8 + $0x5a8] ss:$12 sps:$4 sm:$0xff]   ;;  %v6433_v15 = vld [vmem:[#allocation8 + $0x590] ss:$12 sps:$4 sm:$0xff]  }
 0x23c   :  { %v2443_v22 = vmax.f32 %v2418_v16, 0.0  ;;  %v6832_v32 = vpack.c.bf16 %v2442_v18, %v2430_v27  ;;  %v6428_v10 = vld [vmem:[#allocation8 + $0x320] ss:$12 sps:$4 sm:$0xff]   ;;  %v6430_v14 = vld [vmem:[#allocation8 + $0x3c8] ss:$12 sps:$4 sm:$0xff]  }
 0x23d   :  { %5518 = vmatpush3.bf16.msra.mxu0 %v6384_v17  ;;  %v6435_v29 = vld [vmem:[#allocation8 + $0x770] ss:$12 sps:$4 sm:$0xff]   ;;  %v6437_v18 = vld [vmem:[#allocation8 + $0x578] ss:$12 sps:$4 sm:$0xff]   ;;  %v6441_v27 = vld [vmem:[#allocation8 + $0x560] ss:$12 sps:$4 sm:$0xff]  }
 0x23e   :  { %v6830_v28 = vpack.c.bf16 %v2443_v22, %v2431_v21  ;;  %5519 = vmatprep.subr.bf16.mxu0 %v6386_v19  ;;  %v6434_v16 = vld [vmem:[#allocation8 + $0x4d0] ss:$12 sps:$4 sm:$0xff]   ;;  %v6439_v19 = vld [vmem:[#allocation8 + $0x758] ss:$12 sps:$4 sm:$0xff]  }
 0x23f   :  { %v6436_v17 = vld [vmem:[#allocation8 + $0x6b0] ss:$12 sps:$4 sm:$0xff]   ;;  %v6438_v21 = vld [vmem:[#allocation8 + $0x4b8] ss:$12 sps:$4 sm:$0xff]  }
 0x240   :  { %4640 = vmatprep.mubr.bf16.mxu1 %v6830_v28  ;;  %v6440_v22 = vld [vmem:[#allocation8 + $0x698] ss:$12 sps:$4 sm:$0xff]  }
 0x241   :  { %4641 = vmatmul.mubr.bf16.vlgmr.msra.gmra.mxu1 %v6832_v32  ;;  %5520 = vmatpush3.bf16.msra.mxu0 %v6388_v31  ;;  %v6442_v31 = vld [vmem:[#allocation8 + $0x4a0] ss:$12 sps:$4 sm:$0xff]  }
 0x242   :  { %5534 = vmatpush3.bf16.msra.mxu1 %v6387_v30  ;;  %4724 = vmatprep.mubr.bf16.mxu1 %v6758_v58  ;;  %v6403_v58 = vld [vmem:[#allocation8 + $0x470] ss:$12 sps:$4 sm:$0xff]   ;;  %v6443_v30 = vld [vmem:[#allocation8 + $0x740] ss:$12 sps:$4 sm:$0xff]  }
 0x243   :  { %5535 = vmatprep.subr.bf16.mxu1 %v6389_v36  ;;  %5521 = vmatprep.subr.bf16.mxu0 %v6390_v38  ;;  %v6444_v36 = vld [vmem:[#allocation8 + $0x680] ss:$12 sps:$4 sm:$0xff]   ;;  %v6445_v38 = vld [vmem:[#allocation8 + $0x548] ss:$12 sps:$4 sm:$0xff]  }
 0x245   :  { %5522 = vmatpush3.bf16.msra.mxu0 %v6392_v41  ;;  %v6448_v41 = vld [vmem:[#allocation8 + $0x668] ss:$12 sps:$4 sm:$0xff]  }
 0x246   :  { %5536 = vmatpush3.bf16.msra.mxu1 %v6391_v39  ;;  %5523 = vmatprep.subr.bf16.mxu0 %v6394_v37  ;;  %v6447_v39 = vld [vmem:[#allocation8 + $0x728] ss:$12 sps:$4 sm:$0xff]   ;;  %v6451_v37 = vld [vmem:[#allocation8 + $0x830] ss:$12 sps:$4 sm:$0xff]  }
 0x247   :  { %5537 = vmatprep.subr.bf16.mxu1 %v6393_v12  ;;  %v6449_v12 = vld [vmem:[#allocation8 + $0x8f0] ss:$12 sps:$4 sm:$0xff]  }
 0x249   :  { %5524 = vmatpush3.bf16.msra.mxu0 %v6396_v46  ;;  %v6453_v46 = vld [vmem:[#allocation8 + $0x8d8] ss:$12 sps:$4 sm:$0xff]  }
 0x24a   :  { %5538 = vmatpush3.bf16.msra.mxu1 %v6395_v45  ;;  %5525 = vmatprep.subr.bf16.mxu0 %v6398_v48  ;;  %v6452_v45 = vld [vmem:[#allocation8 + $0x650] ss:$12 sps:$4 sm:$0xff]   ;;  %v6455_v48 = vld [vmem:[#allocation8 + $0x818] ss:$12 sps:$4 sm:$0xff]  }
 0x24b   :  { %5539 = vmatprep.subr.bf16.mxu1 %v6397_v47  ;;  %v6454_v47 = vld [vmem:[#allocation8 + $0x6f8] ss:$12 sps:$4 sm:$0xff]  }
 0x24d   :  { %5526 = vmatpush3.bf16.msra.mxu0 %v6400_v50  ;;  %v6457_v50 = vld [vmem:[#allocation8 + $0x8c0] ss:$12 sps:$4 sm:$0xff]  }
 0x24e   :  { %5540 = vmatpush3.bf16.msra.mxu1 %v6399_v49  ;;  %5555 = vmatprep.subr.bf16.mxu0 %v6403_v58  ;;  %v6456_v49 = vld [vmem:[#allocation8 + $0x638] ss:$12 sps:$4 sm:$0xff]   ;;  %v6459_v58 = vld [vmem:[#allocation8 + $0x800] ss:$12 sps:$4 sm:$0xff]  }
 0x24f   :  { %5541 = vmatprep.subr.bf16.mxu1 %v6401_v51  ;;  %v6458_v51 = vld [vmem:[#allocation8 + $0x6e0] ss:$12 sps:$4 sm:$0xff]  }
 0x250   :  { %4684 = vmatmul.mubr.bf16.vlgmr.msra.gmra.mxu0 %v6734_v0  ;;  %v6414_v0 = vld [vmem:[#allocation8 + $0x188] ss:$12 sps:$4 sm:$0xff]  }
 0x251   :  { %5556 = vmatpush3.bf16.msra.mxu0 %v6404_v56  ;;  %4765 = vmatprep.mubr.bf16.mxu0 %v6784_v40  ;;  %v6418_v40 = vld [vmem:[#allocation8 + $0x410] ss:$12 sps:$4 sm:$0xff]   ;;  %v6461_v56 = vld [vmem:[#allocation8 + $0x8a8] ss:$12 sps:$4 sm:$0xff]  }
 0x252   :  { %5542 = vmatpush3.bf16.msra.mxu1 %v6402_v53  ;;  %5557 = vmatprep.subr.bf16.mxu0 %v6407_v57  ;;  %v6460_v53 = vld [vmem:[#allocation8 + $0x620] ss:$12 sps:$4 sm:$0xff]   ;;  %v6465_v57 = vld [vmem:[#allocation8 + $0x890] ss:$12 sps:$4 sm:$0xff]  }
 0x253   :  { %5543 = vmatprep.subr.bf16.mxu1 %v6405_v43  ;;  %v6462_v43 = vld [vmem:[#allocation8 + $0x6c8] ss:$12 sps:$4 sm:$0xff]  }
 0x255   :  { %5558 = vmatpush3.bf16.msra.mxu0 %v6408_v24  ;;  %v6467_v24 = vld [vmem:[#allocation8 + $0x878] ss:$12 sps:$4 sm:$0xff]  }
 0x256   :  { %5544 = vmatpush3.bf16.msra.mxu1 %v6406_v59  ;;  %5559 = vmatprep.subr.bf16.mxu0 %v6411_v52  ;;  %v6466_v59 = vld [vmem:[#allocation8 + $0x7d0] ss:$12 sps:$4 sm:$0xff]   ;;  %v6469_v52 = vld [vmem:[#allocation8 + $0x860] ss:$12 sps:$4 sm:$0xff]  }
 0x257   :  { %5545 = vmatprep.subr.bf16.mxu1 %v6409_v33  ;;  %v6468_v33 = vld [vmem:[#allocation8 + $0x7b8] ss:$12 sps:$4 sm:$0xff]  }
 0x259   :  { %5560 = vmatpush3.bf16.msra.mxu0 %v6412_v2  ;;  %v6471_v2 = vld [vmem:[#allocation8 + $0x848] ss:$12 sps:$4 sm:$0xff]  }
 0x25a   :  { %5546 = vmatpush3.bf16.msra.mxu1 %v6410_v61  ;;  %5561 = vmatprep.subr.bf16.mxu0 %v6415_v44  ;;  %v6470_v61 = vld [vmem:[#allocation8 + $0x7a0] ss:$12 sps:$4 sm:$0xff]  }
 0x25b   :  { %5547 = vmatprep.subr.bf16.mxu1 %v6413_v7  ;;  %v6472_v7 = vld [vmem:[#allocation8 + $0x788] ss:$12 sps:$4 sm:$0xff]  }
 0x25d   :  { %5562 = vmatpush3.bf16.msra.mxu0 %v6416_v3 }
 0x25e   :  { %5548 = vmatpush3.bf16.msra.mxu1 %v6414_v0  ;;  %5563 = vmatprep.subr.bf16.mxu0 %v6418_v40 }
 0x25f   :  { %5577 = vmatprep.subr.bf16.mxu1 %v6417_v4 }
 0x261   :  { %4725 = vmatmul.mubr.bf16.vlgmr.msra.gmra.mxu1 %v6773_v34  ;;  %5564 = vmatpush3.bf16.msra.mxu0 %v6420_v5  ;;  %v6431_v34 = vld [vmem:[#allocation8 + $0x4e8] ss:$12 sps:$4 sm:$0xff]   ;;  %v6847_v5 = vld [vmem:[#allocation10] sm:$0x7] }
 0x262   :  { %5578 = vmatpush3.bf16.msra.mxu1 %v6419_v13  ;;  %4806 = vmatprep.mubr.bf16.mxu1 %v6794_v42  ;;  %v6432_v42 = vld [vmem:[#allocation8 + $0x308] ss:$12 sps:$4 sm:$0xff]  }
 0x263   :  { %5579 = vmatprep.subr.bf16.mxu1 %v6421_v20  ;;  %5565 = vmatprep.subr.bf16.mxu0 %v6422_v6 }
 0x265   :  { %5566 = vmatpush3.bf16.msra.mxu0 %v6424_v8 }
 0x266   :  { %5580 = vmatpush3.bf16.msra.mxu1 %v6423_v23  ;;  %5567 = vmatprep.subr.bf16.mxu0 %v6426_v55  ;;  %v2845_v23 = vrot.slane %v6847_v5, %v6728_v25  ;;  %v2849_v55 = vrot.slane %v6847_v5, %v6737_v63 }
 0x267   :  { %5581 = vmatprep.subr.bf16.mxu1 %v6425_v62 }
 0x269   :  { %5568 = vmatpush3.bf16.msra.mxu0 %v6428_v10 }
 0x26a   :  { %5582 = vmatpush3.bf16.msra.mxu1 %v6427_v1  ;;  %5569 = vmatprep.subr.bf16.mxu0 %v6430_v14 }
 0x26b   :  { %5583 = vmatprep.subr.bf16.mxu1 %v6429_v11 }
 0x26d   :  { %5570 = vmatpush3.bf16.msra.mxu0 %v6432_v42 }
 0x26e   :  { %5584 = vmatpush3.bf16.msra.mxu1 %v6431_v34  ;;  %5599 = vmatprep.subr.bf16.mxu0 %v6435_v29 }
 0x26f   :  { %5585 = vmatprep.subr.bf16.mxu1 %v6433_v15 }
 0x270   :  { %4766 = vmatmul.mubr.bf16.vlgmr.msra.gmra.mxu0 %v6803_v54  ;;  %v6446_v54 = vld [vmem:[#allocation8 + $0x488] ss:$12 sps:$4 sm:$0xff]   ;;  %v4427_v44 = vpop.f32.mrf.mxu0 }
 0x271   :  { %5600 = vmatpush3.bf16.msra.mxu0 %v6436_v17  ;;  %4847 = vmatprep.mubr.bf16.mxu0 %v6815_v26  ;;  %v6450_v26 = vld [vmem:[#allocation8 + $0x710] ss:$12 sps:$4 sm:$0xff]   ;;  %v4470_v4 = vpop.f32.mrf.mxu1  ;;  %v4428_v1 = vadd.f32 %v4427_v44, %v2845_v23 }
 0x272   :  { %5586 = vmatpush3.bf16.msra.mxu1 %v6434_v16  ;;  %5601 = vmatprep.subr.bf16.mxu0 %v6439_v19  ;;  %v4429_v0 = vpop.f32.mrf.mxu0 }
 0x273   :  { %5587 = vmatprep.subr.bf16.mxu1 %v6437_v18  ;;  %v4430_v11 = vadd.f32 %v4429_v0, %v2849_v55  ;;  %v4471_v42 = vadd.f32 %v4470_v4, %v4428_v1 }
 0x274   :  { %v4431_v3 = vpop.f32.mrf.mxu0 }
 0x275   :  { %5602 = vmatpush3.bf16.msra.mxu0 %v6440_v22  ;;  %v4432_v15 = vadd.f32 %v4431_v3, %v2845_v23 }
 0x276   :  { %5588 = vmatpush3.bf16.msra.mxu1 %v6438_v21  ;;  %5603 = vmatprep.subr.bf16.mxu0 %v6443_v30  ;;  %v4433_v40 = vpop.f32.mrf.mxu0 }
 0x277   :  { %5589 = vmatprep.subr.bf16.mxu1 %v6441_v27  ;;  %v4434_v16 = vadd.f32 %v4433_v40, %v2849_v55 }
 0x279   :  { %5604 = vmatpush3.bf16.msra.mxu0 %v6444_v36 }
 0x27a   :  { %5590 = vmatpush3.bf16.msra.mxu1 %v6442_v31  ;;  %5605 = vmatprep.subr.bf16.mxu0 %v6447_v39 }
 0x27b   :  { %5591 = vmatprep.subr.bf16.mxu1 %v6445_v38 }
 0x27d   :  { %5606 = vmatpush3.bf16.msra.mxu0 %v6448_v41  ;;  %v4897_v41 = vld [vmem:[#allocation11] sm:$0xff] }
 0x27e   :  { %5592 = vmatpush3.bf16.msra.mxu1 %v6446_v54  ;;  %5607 = vmatprep.subr.bf16.mxu0 %v6450_v26 }
 0x27f   :  { %5621 = vmatprep.subr.bf16.mxu1 %v6449_v12 }
 0x281   :  { %4807 = vmatmul.mubr.bf16.vlgmr.msra.gmra.mxu1 %v6805_v9  ;;  %5608 = vmatpush3.bf16.msra.mxu0 %v6452_v45  ;;  %v6463_v9 = vld [vmem:[#allocation8 + $0x7e8] ss:$12 sps:$4 sm:$0xff]  }
 0x282   :  { %5622 = vmatpush3.bf16.msra.mxu1 %v6451_v37  ;;  %4888 = vmatprep.mubr.bf16.mxu1 %v6830_v28  ;;  %v6464_v28 = vld [vmem:[#allocation8 + $0x608] ss:$12 sps:$4 sm:$0xff]  }
 0x283   :  { %5623 = vmatprep.subr.bf16.mxu1 %v6453_v46  ;;  %5609 = vmatprep.subr.bf16.mxu0 %v6454_v47  ;;  %v4898_v47 = vld [vmem:[#allocation11 + $0x8] sm:$0xff] }
 0x285   :  { %5610 = vmatpush3.bf16.msra.mxu0 %v6456_v49 }
 0x286   :  { %5624 = vmatpush3.bf16.msra.mxu1 %v6455_v48  ;;  %5611 = vmatprep.subr.bf16.mxu0 %v6458_v51 }
 0x287   :  { %5625 = vmatprep.subr.bf16.mxu1 %v6457_v50 }
 0x289   :  { %5612 = vmatpush3.bf16.msra.mxu0 %v6460_v53  ;;  %v4900_v53 = vld [vmem:[#allocation11 + $0x18] sm:$0xff] }
 0x28a   :  { %5626 = vmatpush3.bf16.msra.mxu1 %v6459_v58  ;;  %5613 = vmatprep.subr.bf16.mxu0 %v6462_v43 }
 0x28b   :  { %5627 = vmatprep.subr.bf16.mxu1 %v6461_v56 }
 0x28d   :  { %5614 = vmatpush3.bf16.msra.mxu0 %v6464_v28 }
 0x28e   :  { %5628 = vmatpush3.bf16.msra.mxu1 %v6463_v9 }
 0x28f   :  { %5629 = vmatprep.subr.bf16.mxu1 %v6465_v57  ;;  %v4901_v57 = vld [vmem:[#allocation11 + $0x20] sm:$0xff] }
 0x290   :  { %4848 = vmatmul.mubr.bf16.vlgmr.msra.gmra.mxu0 %v6821_v60  ;;  %v4472_v60 = vpop.f32.mrf.mxu1 }
 0x291   :  { %v4473_v29 = vadd.f32 %v4472_v60, %v4430_v11 }
 0x292   :  { %5630 = vmatpush3.bf16.msra.mxu1 %v6466_v59  ;;  %v4474_v20 = vpop.f32.mrf.mxu1 }
 0x293   :  { %5631 = vmatprep.subr.bf16.mxu1 %v6467_v24  ;;  %v4475_v21 = vadd.f32 %v4474_v20, %v4432_v15 }
 0x294   :  { %v4476_v8 = vpop.f32.mrf.mxu1 }
 0x295   :  { %v4477_v22 = vadd.f32 %v4476_v8, %v4434_v16 }
 0x296   :  { %5632 = vmatpush3.bf16.msra.mxu1 %v6468_v33 }
 0x297   :  { %5633 = vmatprep.subr.bf16.mxu1 %v6469_v52 }
 0x29a   :  { %5634 = vmatpush3.bf16.msra.mxu1 %v6470_v61 }
 0x29b   :  { %5635 = vmatprep.subr.bf16.mxu1 %v6471_v2 }
 0x29e   :  { %5636 = vmatpush3.bf16.msra.mxu1 %v6472_v7 }
 0x2a1   :  { %4889 = vmatmul.mubr.bf16.vlgmr.msra.gmra.mxu1 %v6832_v32 }
 0x2b0   :  { %v4513_v13 = vpop.f32.mrf.mxu0 }
 0x2b1   :  { %v4556_v32 = vpop.f32.mrf.mxu1  ;;  %v4514_v17 = vadd.f32 %v4513_v13, %v4471_v42 }
 0x2b2   :  { %v4515_v6 = vpop.f32.mrf.mxu0 }
 0x2b3   :  { %v4558_v14 = vpop.f32.mrf.mxu1  ;;  %v4516_v25 = vadd.f32 %v4515_v6, %v4473_v29  ;;  %v4557_v27 = vadd.f32 %v4556_v32, %v4514_v17 }
 0x2b4   :  { %v4517_v62 = vpop.f32.mrf.mxu0 }
 0x2b5   :  { %v4560_v18 = vpop.f32.mrf.mxu1  ;;  %v4518_v30 = vadd.f32 %v4517_v62, %v4475_v21  ;;  %v4559_v36 = vadd.f32 %v4558_v14, %v4516_v25  ;;  %v2853_v62 = vrot.slane %v6847_v5, %v6762_v35 }
 0x2b6   :  { %v4519_v10 = vpop.f32.mrf.mxu0 }
 0x2b7   :  { %v4562_v31 = vpop.f32.mrf.mxu1  ;;  %v4520_v38 = vadd.f32 %v4519_v10, %v4477_v22  ;;  %v4561_v12 = vadd.f32 %v4560_v18, %v4518_v30 }
 0x2b9   :  { %v4563_v48 = vadd.f32 %v4562_v31, %v4520_v38 }
 0x2f0   :  { %v4599_v34 = vpop.f32.mrf.mxu0 }
 0x2f1   :  { %v4600_v39 = vadd.f32 %v4599_v34, %v4557_v27 }
 0x2f2   :  { %v4601_v19 = vpop.f32.mrf.mxu0 }
 0x2f3   :  { %v4602_v26 = vadd.f32 %v4601_v19, %v4559_v36 }
 0x2f4   :  { %v4603_v63 = vpop.f32.mrf.mxu0 }
 0x2f5   :  { %v4604_v49 = vadd.f32 %v4603_v63, %v4561_v12 }
 0x2f6   :  { %v4605_v45 = vpop.f32.mrf.mxu0 }
 0x2f7   :  { %v4606_v56 = vadd.f32 %v4605_v45, %v4563_v48  ;;  %v4902_v48 = vld [vmem:[#allocation11 + $0x28] sm:$0xff] }
 0x301   :  { %v4642_v54 = vpop.f32.mrf.mxu1 }
 0x302   :  { %v4643_v37 = vadd.f32 %v4642_v54, %v4600_v39  ;;  %v4899_v54 = vld [vmem:[#allocation11 + $0x10] sm:$0xff] }
 0x303   :  { %v4644_v46 = vpop.f32.mrf.mxu1 }
 0x304   :  { %v4903_v50 = vmul.f32 %v4897_v41, %v4643_v37  ;;  %v4645_v51 = vadd.f32 %v4644_v46, %v4602_v26 }
 0x305   :  { %v4646_v58 = vpop.f32.mrf.mxu1 }
 0x306   :  { %4909 = vst [vmem:[#allocation13] sm:$0xff] %v4903_v50  ;;  %v4904_v43 = vmul.f32 %v4898_v47, %v4645_v51  ;;  %v4647_v9 = vadd.f32 %v4646_v58, %v4604_v49 }
 0x307   :  { %v4648_v28 = vpop.f32.mrf.mxu1 }
 0x308   :  { %4910 = vst [vmem:[#allocation13 + $0x8] sm:$0xff] %v4904_v43  ;;  %v4906_v59 = vmul.f32 %v4900_v53, %v4647_v9  ;;  %v4649_v24 = vadd.f32 %v4648_v28, %v4606_v56 }
 0x30a   :  { %4912 = vst [vmem:[#allocation13 + $0x18] sm:$0xff] %v4906_v59  ;;  %v4907_v33 = vmul.f32 %v4901_v57, %v4649_v24 }
 0x30c   :  { %4913 = vst [vmem:[#allocation13 + $0x20] sm:$0xff] %v4907_v33 }
 0x310   :  { %v5527_v52 = vpop.f32.mrf.mxu0 }
 0x312   :  { %v5528_v61 = vpop.f32.mrf.mxu0 }
 0x313   :  { %v5529_v55 = vadd.f32 %v5528_v61, %v5527_v52 }
 0x314   :  { %v5530_v2 = vpop.f32.mrf.mxu0 }
 0x315   :  { %v4686_v11 = vadd.f32 %v5529_v55, %v2853_v62 }
 0x316   :  { %v5531_v7 = vpop.f32.mrf.mxu0 }
 0x317   :  { %v5532_v14 = vadd.f32 %v5531_v7, %v5530_v2 }
 0x319   :  { %v4689_v18 = vadd.f32 %v5532_v14, %v2853_v62 }
 0x321   :  { %v5549_v44 = vpop.f32.mrf.mxu1 }
 0x323   :  { %v5550_v3 = vpop.f32.mrf.mxu1 }
 0x324   :  { %v5551_v1 = vadd.f32 %v5550_v3, %v5549_v44 }
 0x325   :  { %v5552_v40 = vpop.f32.mrf.mxu1 }
 0x326   :  { %v4727_v15 = vadd.f32 %v5551_v1, %v4686_v11 }
 0x327   :  { %v5553_v13 = vpop.f32.mrf.mxu1 }
 0x328   :  { %v5554_v29 = vadd.f32 %v5553_v13, %v5552_v40 }
 0x32a   :  { %v4730_v30 = vadd.f32 %v5554_v29, %v4689_v18 }
 0x330   :  { %v5571_v0 = vpop.f32.mrf.mxu0 }
 0x332   :  { %v5572_v4 = vpop.f32.mrf.mxu0 }
 0x333   :  { %v5573_v34 = vadd.f32 %v5572_v4, %v5571_v0 }
 0x334   :  { %v5574_v60 = vpop.f32.mrf.mxu0 }
 0x335   :  { %v4768_v19 = vadd.f32 %v5573_v34, %v4727_v15 }
 0x336   :  { %v5575_v20 = vpop.f32.mrf.mxu0 }
 0x337   :  { %v5576_v21 = vadd.f32 %v5575_v20, %v5574_v60 }
 0x339   :  { %v4771_v63 = vadd.f32 %v5576_v21, %v4730_v30 }
 0x341   :  { %v5593_v6 = vpop.f32.mrf.mxu1 }
 0x343   :  { %v5594_v8 = vpop.f32.mrf.mxu1 }
 0x344   :  { %v5595_v16 = vadd.f32 %v5594_v8, %v5593_v6 }
 0x345   :  { %v5596_v10 = vpop.f32.mrf.mxu1 }
 0x346   :  { %v4809_v35 = vadd.f32 %v5595_v16, %v4768_v19 }
 0x347   :  { %v5597_v17 = vpop.f32.mrf.mxu1 }
 0x348   :  { %v5598_v5 = vadd.f32 %v5597_v17, %v5596_v10 }
 0x34a   :  { %v4812_v12 = vadd.f32 %v5598_v5, %v4771_v63 }
 0x350   :  { %v5615_v23 = vpop.f32.mrf.mxu0 }
 0x352   :  { %v5616_v32 = vpop.f32.mrf.mxu0 }
 0x353   :  { %v5617_v25 = vadd.f32 %v5616_v32, %v5615_v23 }
 0x354   :  { %v5618_v42 = vpop.f32.mrf.mxu0 }
 0x355   :  { %v4850_v36 = vadd.f32 %v5617_v25, %v4809_v35 }
 0x356   :  { %v5619_v22 = vpop.f32.mrf.mxu0 }
 0x357   :  { %v5620_v38 = vadd.f32 %v5619_v22, %v5618_v42 }
 0x359   :  { %v4853_v45 = vadd.f32 %v5620_v38, %v4812_v12 }
 0x361   :  { %v5637_v27 = vpop.f32.mrf.mxu1 }
 0x363   :  { %v5638_v31 = vpop.f32.mrf.mxu1 }
 0x364   :  { %v5639_v39 = vadd.f32 %v5638_v31, %v5637_v27 }
 0x365   :  { %v5640_v41 = vpop.f32.mrf.mxu1 }
 0x366   :  { %v4891_v26 = vadd.f32 %v5639_v39, %v4850_v36 }
 0x367   :  { %v5641_v37 = vpop.f32.mrf.mxu1 }
 0x368   :  { %v4905_v46 = vmul.f32 %v4899_v54, %v4891_v26  ;;  %v5642_v47 = vadd.f32 %v5641_v37, %v5640_v41 }
 0x36a   :  { %4911 = vst [vmem:[#allocation13 + $0x10] sm:$0xff] %v4905_v46  ;;  %v4894_v49 = vadd.f32 %v5642_v47, %v4853_v45 }
 0x36c   :  { %v4908_v50 = vmul.f32 %v4902_v48, %v4894_v49 }
 0x36e   :  { %4914 = vst [vmem:[#allocation13 + $0x28] sm:$0xff] %v4908_v50 }
 0x36f   :  { %6605 = shalt.err (!%p6602_p6)
}
 0x370   :  { %4926 = dma.vmem_to_hbm [thread:$0]  %s4921_s5, 768, %s6867_s6, [#allocation4], %s6631_s13, %s6631_s13, %s6632_s14  }
 0x371   :  { %6622 = dma.done.wait [#allocation4], 768  }
 0x372   :  { %6623 = vsyncadd [#allocation4], 4294966528 }
 0x373   :  { %4930 = vsyncpa [#allocation3], 1 }
 0x374   :  { %4931 = vsyncpa [#allocation6], 1 }
 0x375   :  { %4932 = vsyncpa [#allocation9], 1 }
 0x376   :  { %4933 = vsyncpa [#allocation12], 1 }
 0x377   :  { %4934 = vsyncpa [#allocation4], 1 }

</bundles_post_ra>
